<compile_context>
chip_gen: v7x
topology: tpu7x:2x2x1
jax: 0.10.0
libtpu: 0.0.40
codegen_flags: <defaults>
</compile_context>

<pallas_src>
import functools

import jax
import jax.numpy as jnp
from jax.experimental import pallas as pl
from jax.experimental.pallas import tpu as pltpu


LEAKY_SLOPE = 0.2
# Above the 16 MiB (v5e) / 32 MiB (v6e/v7x) scoped defaults, with headroom
# under v7x's 64 MiB physical VMEM.
_VMEM_LIMIT = 48 * 1024 * 1024


def _cdiv(a, b):
    return -(-a // b)


def _round_up(x, m):
    return ((x + m - 1) // m) * m


def _choose_row_tile(m, max_tile):
    """Balanced row tiling; tile is a multiple of 8 or equals the padded M."""
    ntiles = max(1, _cdiv(m, max_tile))
    if ntiles == 1:
        return m, m, 1
    tile = _round_up(_cdiv(m, ntiles), 8)
    return tile, tile * ntiles, ntiles


# ----------------------------------------------------------------------------
# Kernel 1: fused  y = [leaky_relu](x @ w + b), tiled over rows.
# ----------------------------------------------------------------------------
def _linear_kernel(x_ref, w_ref, b_ref, o_ref, *, leaky):
    y = jnp.dot(x_ref[...], w_ref[...], preferred_element_type=jnp.float32)
    y = y + b_ref[...]                       # [1, N] broadcast over rows
    if leaky:
        y = jnp.where(y > 0, y, LEAKY_SLOPE * y)
    o_ref[...] = y.astype(o_ref.dtype)


def pallas_linear(x, w, b, *, leaky, block_m=256, out_dtype=jnp.bfloat16):
    """x: [M, K] bf16, w: [K, N] bf16, b: [1, N] f32 -> [M, N] out_dtype."""
    m, k = x.shape
    k2, n = w.shape
    assert k == k2, (k, k2)
    tm, mp, ntiles = _choose_row_tile(m, block_m)
    if mp != m:
        x = jnp.pad(x, ((0, mp - m), (0, 0)))
    cost = pl.CostEstimate(
        flops=2 * mp * k * n,
        transcendentals=0,
        bytes_accessed=(x.size * x.dtype.itemsize + w.size * w.dtype.itemsize
                        + b.size * b.dtype.itemsize
                        + mp * n * jnp.dtype(out_dtype).itemsize))
    out = pl.pallas_call(
        functools.partial(_linear_kernel, leaky=leaky),
        out_shape=jax.ShapeDtypeStruct((mp, n), out_dtype),
        grid_spec=pltpu.PrefetchScalarGridSpec(
            num_scalar_prefetch=0,
            grid=(ntiles,),
            in_specs=[
                pl.BlockSpec((tm, k), lambda i: (i, 0)),   # row tile of x
                pl.BlockSpec((k, n), lambda i: (0, 0)),    # weight, resident
                pl.BlockSpec((1, n), lambda i: (0, 0)),    # bias, resident
            ],
            out_specs=pl.BlockSpec((tm, n), lambda i: (i, 0)),
        ),
        compiler_params=pltpu.CompilerParams(
            dimension_semantics=("parallel",),
            vmem_limit_bytes=_VMEM_LIMIT),
        cost_estimate=cost,
    )(x, w, b)
    return out if mp == m else out[:m]


# ----------------------------------------------------------------------------
# Kernel 2 (fused tail): Conv2d(32,1,5,s=2,p=1) -> Flatten -> Linear(121,64)
#                        -> LeakyReLU(0.2) -> Linear(64,out)
# colT holds the conv2 im2col with the 121 output positions in lanes (pad 128),
# so the whole chain is lane-dense and VMEM resident; only [TB,128] hits HBM.
# ----------------------------------------------------------------------------
def _tail_kernel(colT_ref, wc2_ref, w2_ref, bf_ref, w3_ref, b3_ref, o_ref):
    col = colT_ref[...].astype(jnp.float32)                  # [TB, 800, 128]
    # Conv2d(32,1): weighted reduction over the 800 (tap, cin) rows.
    z = jnp.sum(col * wc2_ref[...][None, :, :], axis=1)      # [TB, 128]
    # Linear(121,64) + LeakyReLU; the conv bias is folded into bf.
    h = jnp.dot(z.astype(jnp.bfloat16), w2_ref[...],
                preferred_element_type=jnp.float32) + bf_ref[...]
    h = jnp.where(h > 0, h, LEAKY_SLOPE * h)                  # [TB, 64]
    # Linear(64, out), output lanes zero-padded to 128 (dense stores).
    y = jnp.dot(h.astype(jnp.bfloat16), w3_ref[...],
                preferred_element_type=jnp.float32) + b3_ref[...]
    o_ref[...] = y                                            # [TB, 128] f32


def pallas_conv2_head(colT, wc2, w2p, bias_f, w3p, b3p, *, block_b=8):
    b, kk, pp = colT.shape            # [B, 800, 128]
    n_mid = w2p.shape[1]              # 64
    n_pad = w3p.shape[1]              # 128 (output_size padded to lanes)
    tb, bp, ntiles = _choose_row_tile(b, block_b)
    if bp != b:
        colT = jnp.pad(colT, ((0, bp - b), (0, 0), (0, 0)))
    cost = pl.CostEstimate(
        flops=2 * bp * (kk * pp + pp * n_mid + n_mid * n_pad),
        transcendentals=0,
        bytes_accessed=(colT.size * colT.dtype.itemsize
                        + wc2.size * 4 + w2p.size * 2 + w3p.size * 2
                        + bias_f.size * 4 + b3p.size * 4 + bp * n_pad * 4))
    out = pl.pallas_call(
        _tail_kernel,
        out_shape=jax.ShapeDtypeStruct((bp, n_pad), jnp.float32),
        grid_spec=pltpu.PrefetchScalarGridSpec(
            num_scalar_prefetch=0,
            grid=(ntiles,),
            in_specs=[
                pl.BlockSpec((tb, kk, pp), lambda i: (i, 0, 0)),  # colT tile
                pl.BlockSpec((kk, 1), lambda i: (0, 0)),          # conv2 weight
                pl.BlockSpec((pp, n_mid), lambda i: (0, 0)),      # w2 (pad 128)
                pl.BlockSpec((1, n_mid), lambda i: (0, 0)),       # fused bias
                pl.BlockSpec((n_mid, n_pad), lambda i: (0, 0)),   # w3 (pad 128)
                pl.BlockSpec((1, n_pad), lambda i: (0, 0)),       # b3 (pad 128)
            ],
            out_specs=pl.BlockSpec((tb, n_pad), lambda i: (i, 0)),
        ),
        compiler_params=pltpu.CompilerParams(
            dimension_semantics=("parallel",),
            vmem_limit_bytes=_VMEM_LIMIT),
        cost_estimate=cost,
    )(colT, wc2, w2p, bias_f, w3p, b3p)
    return out if bp == b else out[:b]


# ----------------------------------------------------------------------------
# XLA glue: nearest upsample x2 and im2col index shuffling (pure data movement;
# all FLOPs are inside the Pallas kernels above).
# ----------------------------------------------------------------------------
def upsample2_nearest(x):  # x: [B, H, W, C]
    return jnp.repeat(jnp.repeat(x, 2, axis=1), 2, axis=2)


def im2col_rows(x, kh, kw, stride, k_pad=None):
    """NHWC -> [B*OH*OW, KH*KW*C] (tap-major, C minor), optional K zero-pad."""
    b, h, w, c = x.shape
    oh = (h - kh) // stride + 1
    ow = (w - kw) // stride + 1
    taps = [x[:, i:i + stride * oh:stride, j:j + stride * ow:stride, :]
            for i in range(kh) for j in range(kw)]
    col = jnp.stack(taps, axis=3).reshape(b * oh * ow, kh * kw * c)
    if k_pad is not None and k_pad > kh * kw * c:
        col = jnp.pad(col, ((0, 0), (0, k_pad - kh * kw * c)))
    return col, oh, ow


def im2col_pos_lanes(x, kh, kw, stride, pos_pad):
    """NHWC -> [B, KH*KW*C, OH*OW (zero-padded)], output positions in lanes."""
    b, h, w, c = x.shape
    oh = (h - kh) // stride + 1
    ow = (w - kw) // stride + 1
    taps = [x[:, i:i + stride * oh:stride, j:j + stride * ow:stride, :]
            for i in range(kh) for j in range(kw)]
    col = jnp.stack(taps, axis=1)                  # [B, 25, OH, OW, C]
    col = col.transpose(0, 1, 4, 2, 3)             # [B, 25, C, OH, OW]
    col = col.reshape(b, kh * kw * c, oh * ow)     # k = tap*C + c ; p = oh*OW+ow
    if pos_pad > oh * ow:
        col = jnp.pad(col, ((0, 0), (0, 0), (0, pos_pad - oh * ow)))
    return col, oh, ow


# ----------------------------------------------------------------------------
# Parameters: synthetic init in PyTorch-native layouts + one-time repacking.
# ----------------------------------------------------------------------------
def init_params(key, input_size, output_size):
    keys = jax.random.split(key, 10)
    s = 0.05
    return {
        "w1": s * jax.random.normal(keys[0], (640, input_size), jnp.float32),
        "b1": s * jax.random.normal(keys[1], (640,), jnp.float32),
        "cw1": s * jax.random.normal(keys[2], (32, 10, 5, 5), jnp.float32),
        "cb1": s * jax.random.normal(keys[3], (32,), jnp.float32),
        "cw2": s * jax.random.normal(keys[4], (1, 32, 5, 5), jnp.float32),
        "cb2": s * jax.random.normal(keys[5], (1,), jnp.float32),
        "w2": s * jax.random.normal(keys[6], (64, 121), jnp.float32),
        "b2": s * jax.random.normal(keys[7], (64,), jnp.float32),
        "w3": s * jax.random.normal(keys[8], (output_size, 64), jnp.float32),
        "b3": s * jax.random.normal(keys[9], (output_size,), jnp.float32),
    }


def pack_params(p):
    """One-time: transpose / tap-major repack / zero-pad, bf16 MXU operands."""
    out_size = p["w3"].shape[0]
    n3 = _round_up(out_size, 128)   # lane-dense final store, sliced outside
    # Linear(in, 640)
    w1p = p["w1"].T.astype(jnp.bfloat16)                                 # [in,640]
    b1p = p["b1"].reshape(1, -1).astype(jnp.float32)
    # Conv2d(10,32,5): [KH,KW,Cin,Cout] tap-major, K padded 250 -> 256
    wc1 = p["cw1"].transpose(2, 3, 1, 0).reshape(250, 32)
    wc1 = jnp.pad(wc1, ((0, 6), (0, 0))).astype(jnp.bfloat16)            # [256,32]
    cb1 = p["cb1"].reshape(1, -1).astype(jnp.float32)
    # Conv2d(32,1,5,s2,p1): reduction vector, k = (i*5+j)*32 + c
    wc2 = p["cw2"][0].transpose(1, 2, 0).reshape(800, 1).astype(jnp.float32)
    # Linear(121,64): positions padded 121 -> 128; conv2 bias folded into bias
    w2p = jnp.pad(p["w2"].T, ((0, 7), (0, 0))).astype(jnp.bfloat16)      # [128,64]
    bf = (p["cb2"][0] * p["w2"].sum(axis=1) + p["b2"]).reshape(1, -1)
    bf = bf.astype(jnp.float32)                                          # [1,64]
    # Linear(64,out): output lanes padded to 128
    w3p = jnp.pad(p["w3"].T, ((0, 0), (0, n3 - out_size))).astype(jnp.bfloat16)
    b3p = jnp.pad(p["b3"], (0, n3 - out_size)).reshape(1, -1).astype(jnp.float32)
    return {"w1p": w1p, "b1p": b1p, "wc1": wc1, "cb1": cb1, "wc2": wc2,
            "w2p": w2p, "bf": bf, "w3p": w3p, "b3p": b3p}


# ----------------------------------------------------------------------------
# Forward pass.
# ----------------------------------------------------------------------------
def conv_discriminator_forward(x, pp, *, output_size):
    b = x.shape[0]
    xb = x.astype(jnp.bfloat16)

    # Linear(input_size, 640) + LeakyReLU(0.2)
    h = pallas_linear(xb, pp["w1p"], pp["b1p"], leaky=True, block_m=256)  # [B,640]

    # Reshape([-1,10,8,8]) (NCHW) -> NHWC, nearest Upsample x2
    h = h.reshape(b, 10, 8, 8).transpose(0, 2, 3, 1)                      # [B,8,8,10]
    h = upsample2_nearest(h)                                              # [B,16,16,10]

    # Conv2d(10,32,5) + LeakyReLU(0.2): im2col (K 250->256) + row-tiled matmul
    col, oh, ow = im2col_rows(h, 5, 5, 1, k_pad=256)                      # [B*144,256]
    h = pallas_linear(col, pp["wc1"], pp["cb1"], leaky=True, block_m=512)  # [B*144,32]
    h = h.reshape(b, oh, ow, 32)                                          # [B,12,12,32]

    # Upsample x2, pad=1, then conv2 im2col with 121 output positions in lanes
    h = upsample2_nearest(h)                                              # [B,24,24,32]
    h = jnp.pad(h, ((0, 0), (1, 1), (1, 1), (0, 0)))                      # [B,26,26,32]
    colT, _, _ = im2col_pos_lanes(h, 5, 5, 2, pos_pad=128)                # [B,800,128]

    # Fused tail: Conv2d(32,1,5,s2,p1) -> Flatten -> Linear(121,64)+LeakyReLU
    #             -> Linear(64,out), all in one Pallas kernel (VMEM resident).
    out = pallas_conv2_head(colT, pp["wc2"], pp["w2p"], pp["bf"],
                            pp["w3p"], pp["b3p"], block_b=8)              # [B,128] f32
    return out[:, :output_size]


if __name__ == "__main__":
    input_size = 32
    output_size = 1
    batch = 2

    key = jax.random.PRNGKey(0)
    pkey, xkey = jax.random.split(key)
    raw_params = init_params(pkey, input_size, output_size)
    packed = pack_params(raw_params)
    x = jax.random.normal(xkey, (batch, input_size), jnp.float32)

    fwd = jax.jit(functools.partial(conv_discriminator_forward,
                                    output_size=output_size))
    out = jax.block_until_ready(fwd(x, packed))

    assert out.shape == (batch, output_size), out.shape
    assert out.dtype == jnp.float32, out.dtype
    print("KERNEL_OK")
</pallas_src>

<mosaic_0001>
module attributes {stable_mosaic.version = 11 : i64} {
  func.func @_linear_kernel(%arg0: i32, %arg1: memref<2x32xbf16, #tpu.memory_space<vmem>>, %arg2: memref<32x640xbf16, #tpu.memory_space<vmem>>, %arg3: memref<1x640xf32, #tpu.memory_space<vmem>>, %arg4: memref<2x640xbf16, #tpu.memory_space<vmem>>) attributes {dimension_semantics = [#tpu.dimension_semantics<parallel>], iteration_bounds = array<i64: 1>, scalar_prefetch = 0 : i64, scratch_operands = 0 : i64, tpu.core_type = #tpu.core_type<tc>, window_params = [{transform_indices = @transform_0, window_bounds = array<i64: 2, 32>}, {pipeline_mode = #tpu.pipeline_mode<synchronous>, transform_indices = @transform_1, window_bounds = array<i64: 32, 640>}, {pipeline_mode = #tpu.pipeline_mode<synchronous>, transform_indices = @transform_2, window_bounds = array<i64: 1, 640>}, {transform_indices = @transform_3, window_bounds = array<i64: 2, 640>}]} {
    %c0 = arith.constant 0 : index
    %c0_0 = arith.constant 0 : index
    %0 = vector.load %arg1[%c0, %c0_0] : memref<2x32xbf16, #tpu.memory_space<vmem>>, vector<2x32xbf16>
    %c0_1 = arith.constant 0 : index
    %c0_2 = arith.constant 0 : index
    %1 = vector.load %arg2[%c0_1, %c0_2] : memref<32x640xbf16, #tpu.memory_space<vmem>>, vector<32x640xbf16>
    %cst = arith.constant dense<0.000000e+00> : vector<2x640xf32>
    %2 = tpu.matmul %0, %1, %cst {dimension_numbers = #tpu.dot_dimension_numbers<[1], [0], [0], [1], [0, 0, 1, 1], [], []>} : vector<2x32xbf16>, vector<32x640xbf16>, vector<2x640xf32> -> vector<2x640xf32>
    %c0_3 = arith.constant 0 : index
    %c0_4 = arith.constant 0 : index
    %3 = vector.load %arg3[%c0_3, %c0_4] : memref<1x640xf32, #tpu.memory_space<vmem>>, vector<1x640xf32>
    %4 = vector.broadcast %3 : vector<1x640xf32> to vector<2x640xf32>
    %5 = arith.addf %2, %4 : vector<2x640xf32>
    %cst_5 = arith.constant 0.000000e+00 : f32
    %6 = vector.broadcast %cst_5 : f32 to vector<2x640xf32>
    %7 = arith.cmpf ogt, %5, %6 : vector<2x640xf32>
    %cst_6 = arith.constant 2.000000e-01 : f32
    %8 = vector.broadcast %cst_6 : f32 to vector<2x640xf32>
    %9 = arith.mulf %8, %5 : vector<2x640xf32>
    %10 = arith.select %7, %5, %9 : vector<2x640xi1>, vector<2x640xf32>
    %11 = arith.truncf %10 : vector<2x640xf32> to vector<2x640xbf16>
    %c0_7 = arith.constant 0 : index
    %c0_8 = arith.constant 0 : index
    %12 = vector.load %arg4[%c0_7, %c0_8] : memref<2x640xbf16, #tpu.memory_space<vmem>>, vector<2x640xbf16>
    tpu.vector_store %arg4[%c0_7, %c0_8], %11 {strides = array<i32>} : memref<2x640xbf16, #tpu.memory_space<vmem>>, vector<2x640xbf16>,
    return
  }
  func.func @transform_0(%arg0: i32) -> (i32, i32) {
    %c0_i32 = arith.constant 0 : i32
    %c0_i32_0 = arith.constant 0 : i32
    return %arg0, %c0_i32 : i32, i32
  }
  func.func @transform_1(%arg0: i32) -> (i32, i32) {
    %c0_i32 = arith.constant 0 : i32
    %c0_i32_0 = arith.constant 0 : i32
    %c0_i32_1 = arith.constant 0 : i32
    return %c0_i32, %c0_i32_0 : i32, i32
  }
  func.func @transform_2(%arg0: i32) -> (i32, i32) {
    %c0_i32 = arith.constant 0 : i32
    %c0_i32_0 = arith.constant 0 : i32
    %c0_i32_1 = arith.constant 0 : i32
    return %c0_i32, %c0_i32_0 : i32, i32
  }
  func.func @transform_3(%arg0: i32) -> (i32, i32) {
    %c0_i32 = arith.constant 0 : i32
    %c0_i32_0 = arith.constant 0 : i32
    return %arg0, %c0_i32 : i32, i32
  }
}

module attributes {stable_mosaic.version = 11 : i64} {
  func.func @_linear_kernel(%arg0: i32, %arg1: memref<288x256xbf16, #tpu.memory_space<vmem>>, %arg2: memref<256x32xbf16, #tpu.memory_space<vmem>>, %arg3: memref<1x32xf32, #tpu.memory_space<vmem>>, %arg4: memref<288x32xbf16, #tpu.memory_space<vmem>>) attributes {dimension_semantics = [#tpu.dimension_semantics<parallel>], iteration_bounds = array<i64: 1>, scalar_prefetch = 0 : i64, scratch_operands = 0 : i64, tpu.core_type = #tpu.core_type<tc>, window_params = [{transform_indices = @transform_0, window_bounds = array<i64: 288, 256>}, {pipeline_mode = #tpu.pipeline_mode<synchronous>, transform_indices = @transform_1, window_bounds = array<i64: 256, 32>}, {pipeline_mode = #tpu.pipeline_mode<synchronous>, transform_indices = @transform_2, window_bounds = array<i64: 1, 32>}, {transform_indices = @transform_3, window_bounds = array<i64: 288, 32>}]} {
    %c0 = arith.constant 0 : index
    %c0_0 = arith.constant 0 : index
    %0 = vector.load %arg1[%c0, %c0_0] : memref<288x256xbf16, #tpu.memory_space<vmem>>, vector<288x256xbf16>
    %c0_1 = arith.constant 0 : index
    %c0_2 = arith.constant 0 : index
    %1 = vector.load %arg2[%c0_1, %c0_2] : memref<256x32xbf16, #tpu.memory_space<vmem>>, vector<256x32xbf16>
    %cst = arith.constant dense<0.000000e+00> : vector<288x32xf32>
    %2 = tpu.matmul %0, %1, %cst {dimension_numbers = #tpu.dot_dimension_numbers<[1], [0], [0], [1], [0, 0, 1, 1], [], []>} : vector<288x256xbf16>, vector<256x32xbf16>, vector<288x32xf32> -> vector<288x32xf32>
    %c0_3 = arith.constant 0 : index
    %c0_4 = arith.constant 0 : index
    %3 = vector.load %arg3[%c0_3, %c0_4] : memref<1x32xf32, #tpu.memory_space<vmem>>, vector<1x32xf32>
    %4 = vector.broadcast %3 : vector<1x32xf32> to vector<288x32xf32>
    %5 = arith.addf %2, %4 : vector<288x32xf32>
    %cst_5 = arith.constant 0.000000e+00 : f32
    %6 = vector.broadcast %cst_5 : f32 to vector<288x32xf32>
    %7 = arith.cmpf ogt, %5, %6 : vector<288x32xf32>
    %cst_6 = arith.constant 2.000000e-01 : f32
    %8 = vector.broadcast %cst_6 : f32 to vector<288x32xf32>
    %9 = arith.mulf %8, %5 : vector<288x32xf32>
    %10 = arith.select %7, %5, %9 : vector<288x32xi1>, vector<288x32xf32>
    %11 = arith.truncf %10 : vector<288x32xf32> to vector<288x32xbf16>
    %c0_7 = arith.constant 0 : index
    %c0_8 = arith.constant 0 : index
    %12 = vector.load %arg4[%c0_7, %c0_8] : memref<288x32xbf16, #tpu.memory_space<vmem>>, vector<288x32xbf16>
    tpu.vector_store %arg4[%c0_7, %c0_8], %11 {strides = array<i32>} : memref<288x32xbf16, #tpu.memory_space<vmem>>, vector<288x32xbf16>,
    return
  }
  func.func @transform_0(%arg0: i32) -> (i32, i32) {
    %c0_i32 = arith.constant 0 : i32
    %c0_i32_0 = arith.constant 0 : i32
    return %arg0, %c0_i32 : i32, i32
  }
  func.func @transform_1(%arg0: i32) -> (i32, i32) {
    %c0_i32 = arith.constant 0 : i32
    %c0_i32_0 = arith.constant 0 : i32
    %c0_i32_1 = arith.constant 0 : i32
    return %c0_i32, %c0_i32_0 : i32, i32
  }
  func.func @transform_2(%arg0: i32) -> (i32, i32) {
    %c0_i32 = arith.constant 0 : i32
    %c0_i32_0 = arith.constant 0 : i32
    %c0_i32_1 = arith.constant 0 : i32
    return %c0_i32, %c0_i32_0 : i32, i32
  }
  func.func @transform_3(%arg0: i32) -> (i32, i32) {
    %c0_i32 = arith.constant 0 : i32
    %c0_i32_0 = arith.constant 0 : i32
    return %arg0, %c0_i32 : i32, i32
  }
}

module attributes {stable_mosaic.version = 11 : i64} {
  func.func @_tail_kernel(%arg0: i32, %arg1: memref<2x800x128xbf16, #tpu.memory_space<vmem>>, %arg2: memref<800x1xf32, #tpu.memory_space<vmem>>, %arg3: memref<128x64xbf16, #tpu.memory_space<vmem>>, %arg4: memref<1x64xf32, #tpu.memory_space<vmem>>, %arg5: memref<64x128xbf16, #tpu.memory_space<vmem>>, %arg6: memref<1x128xf32, #tpu.memory_space<vmem>>, %arg7: memref<2x128xf32, #tpu.memory_space<vmem>>) attributes {dimension_semantics = [#tpu.dimension_semantics<parallel>], iteration_bounds = array<i64: 1>, scalar_prefetch = 0 : i64, scratch_operands = 0 : i64, tpu.core_type = #tpu.core_type<tc>, window_params = [{transform_indices = @transform_0, window_bounds = array<i64: 2, 800, 128>}, {pipeline_mode = #tpu.pipeline_mode<synchronous>, transform_indices = @transform_1, window_bounds = array<i64: 800, 1>}, {pipeline_mode = #tpu.pipeline_mode<synchronous>, transform_indices = @transform_2, window_bounds = array<i64: 128, 64>}, {pipeline_mode = #tpu.pipeline_mode<synchronous>, transform_indices = @transform_3, window_bounds = array<i64: 1, 64>}, {pipeline_mode = #tpu.pipeline_mode<synchronous>, transform_indices = @transform_4, window_bounds = array<i64: 64, 128>}, {pipeline_mode = #tpu.pipeline_mode<synchronous>, transform_indices = @transform_5, window_bounds = array<i64: 1, 128>}, {transform_indices = @transform_6, window_bounds = array<i64: 2, 128>}]} {
    %c0 = arith.constant 0 : index
    %c0_0 = arith.constant 0 : index
    %c0_1 = arith.constant 0 : index
    %0 = vector.load %arg1[%c0, %c0_0, %c0_1] : memref<2x800x128xbf16, #tpu.memory_space<vmem>>, vector<2x800x128xbf16>
    %1 = arith.extf %0 : vector<2x800x128xbf16> to vector<2x800x128xf32>
    %c0_2 = arith.constant 0 : index
    %c0_3 = arith.constant 0 : index
    %2 = vector.load %arg2[%c0_2, %c0_3] : memref<800x1xf32, #tpu.memory_space<vmem>>, vector<800x1xf32>
    %3 = vector.shape_cast %2 : vector<800x1xf32> to vector<1x800x1xf32>
    %4 = vector.broadcast %3 : vector<1x800x1xf32> to vector<2x800x128xf32>
    %5 = arith.mulf %1, %4 : vector<2x800x128xf32>
    %cst = arith.constant dense<0.000000e+00> : vector<2x128xf32>
    %6 = vector.multi_reduction <add>, %5, %cst [1] : vector<2x800x128xf32> to vector<2x128xf32>
    %7 = arith.truncf %6 : vector<2x128xf32> to vector<2x128xbf16>
    %c0_4 = arith.constant 0 : index
    %c0_5 = arith.constant 0 : index
    %8 = vector.load %arg3[%c0_4, %c0_5] : memref<128x64xbf16, #tpu.memory_space<vmem>>, vector<128x64xbf16>
    %cst_6 = arith.constant dense<0.000000e+00> : vector<2x64xf32>
    %9 = tpu.matmul %7, %8, %cst_6 {dimension_numbers = #tpu.dot_dimension_numbers<[1], [0], [0], [1], [0, 0, 1, 1], [], []>} : vector<2x128xbf16>, vector<128x64xbf16>, vector<2x64xf32> -> vector<2x64xf32>
    %c0_7 = arith.constant 0 : index
    %c0_8 = arith.constant 0 : index
    %10 = vector.load %arg4[%c0_7, %c0_8] : memref<1x64xf32, #tpu.memory_space<vmem>>, vector<1x64xf32>
    %11 = vector.broadcast %10 : vector<1x64xf32> to vector<2x64xf32>
    %12 = arith.addf %9, %11 : vector<2x64xf32>
    %cst_9 = arith.constant 0.000000e+00 : f32
    %13 = vector.broadcast %cst_9 : f32 to vector<2x64xf32>
    %14 = arith.cmpf ogt, %12, %13 : vector<2x64xf32>
    %cst_10 = arith.constant 2.000000e-01 : f32
    %15 = vector.broadcast %cst_10 : f32 to vector<2x64xf32>
    %16 = arith.mulf %15, %12 : vector<2x64xf32>
    %17 = arith.select %14, %12, %16 : vector<2x64xi1>, vector<2x64xf32>
    %18 = arith.truncf %17 : vector<2x64xf32> to vector<2x64xbf16>
    %c0_11 = arith.constant 0 : index
    %c0_12 = arith.constant 0 : index
    %19 = vector.load %arg5[%c0_11, %c0_12] : memref<64x128xbf16, #tpu.memory_space<vmem>>, vector<64x128xbf16>
    %cst_13 = arith.constant dense<0.000000e+00> : vector<2x128xf32>
    %20 = tpu.matmul %18, %19, %cst_13 {dimension_numbers = #tpu.dot_dimension_numbers<[1], [0], [0], [1], [0, 0, 1, 1], [], []>} : vector<2x64xbf16>, vector<64x128xbf16>, vector<2x128xf32> -> vector<2x128xf32>
    %c0_14 = arith.constant 0 : index
    %c0_15 = arith.constant 0 : index
    %21 = vector.load %arg6[%c0_14, %c0_15] : memref<1x128xf32, #tpu.memory_space<vmem>>, vector<1x128xf32>
    %22 = vector.broadcast %21 : vector<1x128xf32> to vector<2x128xf32>
    %23 = arith.addf %20, %22 : vector<2x128xf32>
    %c0_16 = arith.constant 0 : index
    %c0_17 = arith.constant 0 : index
    %24 = vector.load %arg7[%c0_16, %c0_17] : memref<2x128xf32, #tpu.memory_space<vmem>>, vector<2x128xf32>
    tpu.vector_store %arg7[%c0_16, %c0_17], %23 {strides = array<i32>} : memref<2x128xf32, #tpu.memory_space<vmem>>, vector<2x128xf32>,
    return
  }
  func.func @transform_0(%arg0: i32) -> (i32, i32, i32) {
    %c0_i32 = arith.constant 0 : i32
    %c0_i32_0 = arith.constant 0 : i32
    %c0_i32_1 = arith.constant 0 : i32
    return %arg0, %c0_i32, %c0_i32_0 : i32, i32, i32
  }
  func.func @transform_1(%arg0: i32) -> (i32, i32) {
    %c0_i32 = arith.constant 0 : i32
    %c0_i32_0 = arith.constant 0 : i32
    %c0_i32_1 = arith.constant 0 : i32
    return %c0_i32, %c0_i32_0 : i32, i32
  }
  func.func @transform_2(%arg0: i32) -> (i32, i32) {
    %c0_i32 = arith.constant 0 : i32
    %c0_i32_0 = arith.constant 0 : i32
    %c0_i32_1 = arith.constant 0 : i32
    return %c0_i32, %c0_i32_0 : i32, i32
  }
  func.func @transform_3(%arg0: i32) -> (i32, i32) {
    %c0_i32 = arith.constant 0 : i32
    %c0_i32_0 = arith.constant 0 : i32
    %c0_i32_1 = arith.constant 0 : i32
    return %c0_i32, %c0_i32_0 : i32, i32
  }
  func.func @transform_4(%arg0: i32) -> (i32, i32) {
    %c0_i32 = arith.constant 0 : i32
    %c0_i32_0 = arith.constant 0 : i32
    %c0_i32_1 = arith.constant 0 : i32
    return %c0_i32, %c0_i32_0 : i32, i32
  }
  func.func @transform_5(%arg0: i32) -> (i32, i32) {
    %c0_i32 = arith.constant 0 : i32
    %c0_i32_0 = arith.constant 0 : i32
    %c0_i32_1 = arith.constant 0 : i32
    return %c0_i32, %c0_i32_0 : i32, i32
  }
  func.func @transform_6(%arg0: i32) -> (i32, i32) {
    %c0_i32 = arith.constant 0 : i32
    %c0_i32_0 = arith.constant 0 : i32
    return %arg0, %c0_i32 : i32, i32
  }
}

</mosaic_0001>

<bundles_post_ra>
// kernel: conv_discriminator_forward.3
= control target key start
LH: loop header
LB: loop body
LE: loop exit
PB: predicated region body
PF: predicated region fallthrough
CT: control target
= control target key end

     0   :  { %8 = vsyncpa [#allocation3], 0  ;;  %s485_s0 = inlined_call_operand.vmem [shape: bf16[2,32], index: 0, kind: input, shape index: {}]   ;;  %s486_s1 = inlined_call_operand.hbm [shape: bf16[32,640], index: 1, kind: input, shape index: {}]   ;;  %s487_s2 = inlined_call_operand.hbm [shape: f32[1,640], index: 2, kind: input, shape index: {}]   ;;  %s488_s3 = inlined_call_operand.vmem [shape: bf16[2,640], index: 3, kind: output, shape index: {}]  }
   0x1   :  { %9 = vsyncpa [#allocation5], 0  ;;  %s427_s12 = smov [#allocation2]   ;;  %s379_s16 = scalar_lea.hbm %s486_s1, 1280 }
   0x2   :  { %s17_s13 = sshll.u32 %s427_s12, 4  ;;  %p380_p0 = scmp.ne.s32.totalorder %s486_s1, %s379_s16  ;;  %s18_s13 = int_to_ptr.vmem [resolvable:$true] %s17_s13 }
   0x3   :  { %p383_p1 = scmp.lt.u32.totalorder %s379_s16, %s486_s1 }
   0x5   :  { %p385_p2 = pnand %p383_p1, %p380_p0 }
   0x7   :  { %388 = shalt.err (!%p385_p2)
}
   0x8   :  { %s389_s21 = scalar_lea.vmem %s18_s13, 1280  ;;  %p394_p4 = scmp.lt.s32.totalorder %s18_s13, %s18_s13 }
   0x9   :  { %p390_p3 = scmp.ne.s32.totalorder %s18_s13, %s389_s21  ;;  %p395_p5 = scmp.lt.s32.totalorder %s389_s21, %s389_s21 }
   0xb   :  { %p396_p6 = por %p395_p5, %p394_p4 }
   0xd   :  { %p397_p7 = pnand %p396_p6, %p390_p3 }
   0xf   :  { %400 = shalt.err (!%p397_p7)
}
  0x10   :  { %s428_s22 = smov 320   ;;  %s429_s23 = smov 20  }
  0x11   :  { %23 = dma.hbm_to_vmem [thread:$0]  %s486_s1, 1280, %s18_s13, [#allocation3], %s428_s22, %s428_s22, %s429_s23  }
  0x12   :  { %s430_s26 = smov [#allocation4]   ;;  %s401_s30 = scalar_lea.hbm %s487_s2, 80 }
  0x13   :  { %s30_s27 = sshll.u32 %s430_s26, 4  ;;  %p402_p8 = scmp.ne.s32.totalorder %s487_s2, %s401_s30  ;;  %s31_s27 = int_to_ptr.vmem [resolvable:$true] %s30_s27 }
  0x14   :  { %p405_p9 = scmp.lt.u32.totalorder %s401_s30, %s487_s2 }
  0x16   :  { %p407_p10 = pnand %p405_p9, %p402_p8 }
  0x18   :  { %410 = shalt.err (!%p407_p10)
}
  0x19   :  { %s411_s8 = scalar_lea.vmem %s31_s27, 80  ;;  %s415_s1 = scalar_lea.vmem %s31_s27, 96 }
  0x1a   :  { %p412_p11 = scmp.ne.s32.totalorder %s31_s27, %s411_s8  ;;  %p416_p12 = scmp.lt.s32.totalorder %s31_s27, %s31_s27 }
  0x1b   :  { %p417_p13 = scmp.lt.s32.totalorder %s415_s1, %s411_s8 }
  0x1d   :  { %p418_p0 = por %p417_p13, %p416_p12 }
  0x1f   :  { %p419_p1 = pnand %p418_p0, %p412_p11 }
  0x21   :  { %422 = shalt.err (!%p419_p1)
}
  0x22   :  { %33 = dma.hbm_to_vmem [thread:$0]  %s487_s2, 80, %s31_s27, [#allocation5]  }
  0x23   :  { %423 = dma.done.wait [#allocation3], 1280  }
  0x24   :  { %424 = vsyncadd [#allocation3], 4294966016 }
  0x25   :  { %425 = dma.done.wait [#allocation5], 80  }
  0x26   :  { %426 = vsyncadd [#allocation5], 4294967216  ;;  %v431_v0 = vmov 0   ;;  %v365_v1 = vld [vmem:[#allocation2 + $0x4] ss:$20 sps:$4 sm:$0xff]   ;;  %vm133_vm0 = vcmask 261120   ;;  %v56_v13 = vlaneseq }
  0x27   :  { %169 = vmatprep.mubr.bf16.mxu0 %v431_v0  ;;  %210 = vmatprep.mubr.bf16.mxu1 %v431_v0  ;;  %v367_v2 = vld [vmem:[#allocation2 + $0xc] ss:$20 sps:$4 sm:$0xff]   ;;  %v370_v4 = vld [vmem:[#allocation2 + $0x8] ss:$20 sps:$4 sm:$0xff]   ;;  %v376_v8 = vld [vmem:[#allocation2 + $0x30] ss:$20 sps:$4 sm:$0xff]  }
  0x28   :  { %137 = vmatprep.subr.bf16.mxu0 %v365_v1  ;;  %v369_v3 = vld [vmem:[#allocation2] ss:$20 sps:$4 sm:$0xff]   ;;  %178 = vmatprep.subr.bf16.mxu1 %v367_v2  ;;  %v375_v7 = vld [vmem:[#allocation2 + $0x28] ss:$20 sps:$4 sm:$0xff]   ;;  %v377_v10 = vld [vmem:[#allocation2 + $0x10] ss:$20 sps:$4 sm:$0xff]  }
  0x29   :  { %v371_v5 = vld [vmem:[#allocation2 + $0x2c] ss:$20 sps:$4 sm:$0xff]   ;;  %138 = vmatpush1.bf16.msra.mxu0 %v369_v3  ;;  %179 = vmatpush1.bf16.msra.mxu1 %v370_v4  ;;  %v373_v6 = vld [vmem:[#allocation2 + $0x34] ss:$20 sps:$4 sm:$0xff]   ;;  %v432_v11 = vmov 0.0   ;;  %vm433_vm1 = vmmov 0  }
  0x2a   :  { %139 = vmatprep.subr.bf16.mxu0 %v371_v5  ;;  %180 = vmatprep.subr.bf16.mxu1 %v373_v6  ;;  %v41_v9 = vld [vmem:[%s485_s0] sm:$0x1]  ;;  %v378_v12 = vld [vmem:[#allocation2 + $0x38] ss:$20 sps:$4 sm:$0xff]   ;;  %v57_v14 = vshrl.u32 %v56_v13, 7 }
  0x2b   :  { %v54_v17 = vld [vmem:[#allocation4] sm:$0x1f]  ;;  %v434_v22 = vmov 1966171168  }
  0x2c   :  { %v58_v15 = vsub.s32 0, %v57_v14  ;;  %v66_v16 = vsub.s32 2, %v57_v14  ;;  %v62_v18 = vsub.s32 1, %v57_v14  ;;  %v70_v19 = vsub.s32 3, %v57_v14 }
  0x2d   :  { %140 = vmatpush1.bf16.msra.mxu0 %v375_v7  ;;  %181 = vmatpush1.bf16.msra.mxu1 %v376_v8  ;;  %v287_v23 = vunpack.c.l.s4 %v434_v22  ;;  %v74_v33 = vsub.s32 4, %v57_v14 }
  0x2e   :  { %349 = vmatprep.subr.bf16.mxu0 %v432_v11  ;;  %v59_v20 = vrot.slane %v54_v17, %v58_v15  ;;  %v67_v21 = vrot.slane %v54_v17, %v66_v16  ;;  %v63_v24 = vrot.slane %v54_v17, %v62_v18  ;;  %v71_v25 = vrot.slane %v54_v17, %v70_v19 }
  0x2f   :  { %v288_v31 = vunpack.c.0.s8 %v287_v23  ;;  %v75_v47 = vrot.slane %v54_v17, %v74_v33 }
  0x30   :  { %341 = vmatmul.mubr.msk.bf16.vlgmr.msra.gmra.mrb[0].mxu0 %vm133_vm0, %v41_v9  ;;  %342 = vmatmul.mubr.msk.bf16.vlgmr.msra.gmra.mrb[0].mxu1 %vm133_vm0, %v41_v9 }
  0x31   :  { %350 = vmatpush3.bf16.msra.mxu0 %v377_v10  ;;  %353 = vmatprep.mubr.msk.bf16.mxu0 %vm433_vm1, %v432_v11  ;;  %v291_v44 = vsub.s32 %v288_v31, %v57_v14 }
  0x32   :  { %351 = vmatprep.subr.bf16.mxu0 %v432_v11 }
  0x35   :  { %352 = vmatpush3.bf16.msra.mxu0 %v378_v12 }
  0x38   :  { %354 = vmatmul.mubr.msk.bf16.vlgmr.msra.gmra.mrb[4].mxu0 %vm133_vm0, %v41_v9 }
 0x103   :  { %v171_v26 = vpop.f32.mrb[0].mxu0  ;;  %v212_v27 = vpop.f32.mrb[0].mxu1 }
 0x104   :  { %v172_v28 = vadd.f32 %v171_v26, %v59_v20  ;;  %v213_v29 = vadd.f32 %v212_v27, %v67_v21  ;;  %v173_v30 = vpop.f32.mrb[1].mxu0  ;;  %v214_v32 = vpop.f32.mrb[1].mxu1 }
 0x105   :  { %v174_v34 = vadd.f32 %v173_v30, %v63_v24  ;;  %v215_v35 = vadd.f32 %v214_v32, %v71_v25  ;;  %v175_v36 = vpop.f32.mrb[2].mxu0  ;;  %v216_v37 = vpop.f32.mrb[2].mxu1 }
 0x106   :  { %vm259_vm2 = vcmp.gt.f32.partialorder %v172_v28, 0.0  ;;  %v264_v38 = vmul.f32 0.2, %v172_v28  ;;  %vm261_vm3 = vcmp.gt.f32.partialorder %v213_v29, 0.0  ;;  %v266_v39 = vmul.f32 0.2, %v213_v29 }
 0x107   :  { %vm260_vm4 = vcmp.gt.f32.partialorder %v174_v34, 0.0  ;;  %v265_v40 = vmul.f32 0.2, %v174_v34  ;;  %vm262_vm5 = vcmp.gt.f32.partialorder %v215_v35, 0.0  ;;  %v267_v41 = vmul.f32 0.2, %v215_v35 }
 0x108   :  { %v269_v42 = vsel %vm259_vm2, %v172_v28, %v264_v38  ;;  %v271_v43 = vsel %vm261_vm3, %v213_v29, %v266_v39  ;;  %v176_v45 = vpop.f32.mrb[3].mxu0  ;;  %v217_v46 = vpop.f32.mrb[3].mxu1 }
 0x109   :  { %v270_v48 = vsel %vm260_vm4, %v174_v34, %v265_v40  ;;  %v272_v49 = vsel %vm262_vm5, %v215_v35, %v267_v41 }
 0x10a   :  { %v344_v50 = vpack.c.bf16 %v270_v48, %v269_v42  ;;  %v345_v51 = vpack.c.bf16 %v272_v49, %v271_v43 }
 0x10b   :  { %v253_v52 = vpop.f32.mrb[4].mxu0 }
 0x10c   :  { %v292_v53 = vrot.slane %v344_v50, %v291_v44  ;;  %v299_v54 = vrot.slane %v345_v51, %v291_v44  ;;  %v254_v55 = vadd.f32 %v253_v52, %v75_v47  ;;  %v355_v56 = vpop.f32.mrb[5].mxu0 }
 0x10d   :  { %v256_v57 = vpop.f32.mrb[6].mxu0 }
 0x10e   :  { %v307_v58 = vcombine.low %v292_v53, %v299_v54  ;;  %vm263_vm6 = vcmp.gt.f32.partialorder %v254_v55, 0.0  ;;  %v268_v59 = vmul.f32 0.2, %v254_v55  ;;  %v356_v60 = vpop.f32.mrb[7].mxu0 }
 0x110   :  { %v273_v61 = vsel %vm263_vm6, %v254_v55, %v268_v59  ;;  %v314_v0 = vrot.slane %v307_v58, %v291_v44 }
 0x111   :  { %v278_v62 = vpack.c.bf16 %v273_v61, %v273_v61 }
 0x113   :  { %v306_v63 = vrot.slane %v278_v62, %v291_v44 }
 0x115   :  { %v321_v1 = vrot.slane %v306_v63, %v291_v44 }
 0x117   :  { %v322_v2 = vcombine.low %v314_v0, %v321_v1 }
 0x119   :  { %324 = vst [vmem:[%s488_s3] sm:$0x1f] %v322_v2 }
 0x11a   :  { %329 = vsyncpa [#allocation3], 1 }
 0x11b   :  { %330 = vsyncpa [#allocation5], 1 }

// kernel: conv_discriminator_forward.4
= control target key start
LH: loop header
LB: loop body
LE: loop exit
PB: predicated region body
PF: predicated region fallthrough
CT: control target
= control target key end

     0   :  { %v1064_v0 = vmov 0   ;;  %vm795_vm2 = vcmask 257024   ;;  %s1458_s1 = inlined_call_operand.vmem [shape: bf16[256,32], index: 1, kind: input, shape index: {}]   ;;  %s1459_s0 = inlined_call_operand.vmem [shape: bf16[288,256], index: 0, kind: input, shape index: {}]   ;;  %s1460_s2 = inlined_call_operand.vmem [shape: f32[1,32], index: 2, kind: input, shape index: {}]   ;;  %s1461_s3 = inlined_call_operand.vmem [shape: bf16[288,32], index: 3, kind: output, shape index: {}]  }
   0x1   :  { %366 = vmatprep.subr.bf16.mxu0 %v1064_v0  ;;  %961 = vmatprep.subr.bf16.mxu1 %v1064_v0  ;;  %v994_v1 = vld [vmem:[%s1458_s1] sm:$0xff]   ;;  %v995_v2 = vld [vmem:[%s1458_s1 + $0x8] sm:$0xff]   ;;  %v996_v3 = vld [vmem:[%s1458_s1 + $0x10] sm:$0xff]  }
   0x2   :  { %367 = vmatpush1.bf16.msra.mxu0 %v994_v1  ;;  %977 = vmatpush1.bf16.msra.mxu1 %v994_v1  ;;  %v997_v4 = vld [vmem:[%s1458_s1 + $0x18] sm:$0xff]   ;;  %v998_v5 = vld [vmem:[%s1458_s1 + $0x20] sm:$0xff]   ;;  %v999_v7 = vld [vmem:[%s1458_s1 + $0x28] sm:$0xff]  }
   0x3   :  { %368 = vmatprep.subr.bf16.mxu0 %v1064_v0  ;;  %962 = vmatprep.subr.bf16.mxu1 %v1064_v0  ;;  %v1012_v6 = vld [vmem:[%s1459_s0 + $0x4] ss:$8 sps:$4 sm:$0xff]   ;;  %v1015_v8 = vld [vmem:[%s1459_s0 + $0x94] ss:$8 sps:$4 sm:$0xff]   ;;  %v1010_v19 = vld [vmem:[%s1459_s0] ss:$8 sps:$4 sm:$0xff]  }
   0x4   :  { %398 = vmatprep.mubr.bf16.mxu0 %v1012_v6  ;;  %470 = vmatprep.mubr.bf16.mxu1 %v1015_v8  ;;  %v1000_v9 = vld [vmem:[%s1458_s1 + $0x30] sm:$0xff]   ;;  %v1001_v10 = vld [vmem:[%s1458_s1 + $0x38] sm:$0xff]   ;;  %v1002_v11 = vld [vmem:[%s1458_s1 + $0x40] sm:$0xff]  }
   0x5   :  { %v1003_v12 = vld [vmem:[%s1458_s1 + $0x48] sm:$0xff]   ;;  %v1004_v13 = vld [vmem:[%s1458_s1 + $0x50] sm:$0xff]   ;;  %v1005_v14 = vld [vmem:[%s1458_s1 + $0x58] sm:$0xff]  }
   0x6   :  { %369 = vmatpush1.bf16.msra.mxu0 %v995_v2  ;;  %978 = vmatpush1.bf16.msra.mxu1 %v995_v2  ;;  %v1006_v15 = vld [vmem:[%s1458_s1 + $0x60] sm:$0xff]   ;;  %v1007_v16 = vld [vmem:[%s1458_s1 + $0x68] sm:$0xff]   ;;  %v1008_v17 = vld [vmem:[%s1458_s1 + $0x70] sm:$0xff]  }
   0x7   :  { %370 = vmatprep.subr.bf16.mxu0 %v1064_v0  ;;  %963 = vmatprep.subr.bf16.mxu1 %v1064_v0  ;;  %v1009_v18 = vld [vmem:[%s1458_s1 + $0x78] sm:$0xff]   ;;  %v1018_v22 = vld [vmem:[%s1459_s0 + $0xa4] ss:$8 sps:$4 sm:$0xff]   ;;  %v1021_v24 = vld [vmem:[%s1459_s0 + $0xa0] ss:$8 sps:$4 sm:$0xff]  }
   0x8   :  { %v1013_v20 = vld [vmem:[%s1459_s0 + $0x90] ss:$8 sps:$4 sm:$0xff]   ;;  %v1016_v21 = vld [vmem:[%s1459_s0 + $0x14] ss:$8 sps:$4 sm:$0xff]   ;;  %v1022_v25 = vld [vmem:[%s1459_s0 + $0x24] ss:$8 sps:$4 sm:$0xff]  }
   0x9   :  { %v1020_v23 = vld [vmem:[%s1459_s0 + $0x10] ss:$8 sps:$4 sm:$0xff]   ;;  %v1024_v26 = vld [vmem:[%s1459_s0 + $0xb4] ss:$8 sps:$4 sm:$0xff]   ;;  %v1026_v27 = vld [vmem:[%s1459_s0 + $0x20] ss:$8 sps:$4 sm:$0xff]  }
   0xa   :  { %371 = vmatpush1.bf16.msra.mxu0 %v996_v3  ;;  %979 = vmatpush1.bf16.msra.mxu1 %v996_v3  ;;  %v1027_v28 = vld [vmem:[%s1459_s0 + $0xb0] ss:$8 sps:$4 sm:$0xff]   ;;  %v1028_v29 = vld [vmem:[%s1459_s0 + $0x34] ss:$8 sps:$4 sm:$0xff]   ;;  %v1030_v30 = vld [vmem:[%s1459_s0 + $0xc4] ss:$8 sps:$4 sm:$0xff]  }
   0xb   :  { %372 = vmatprep.subr.bf16.mxu0 %v1064_v0  ;;  %964 = vmatprep.subr.bf16.mxu1 %v1064_v0  ;;  %v1032_v31 = vld [vmem:[%s1459_s0 + $0x30] ss:$8 sps:$4 sm:$0xff]   ;;  %v1033_v32 = vld [vmem:[%s1459_s0 + $0xc0] ss:$8 sps:$4 sm:$0xff]   ;;  %v1034_v33 = vld [vmem:[%s1459_s0 + $0x44] ss:$8 sps:$4 sm:$0xff]  }
   0xc   :  { %v1036_v34 = vld [vmem:[%s1459_s0 + $0xd4] ss:$8 sps:$4 sm:$0xff]   ;;  %v1038_v35 = vld [vmem:[%s1459_s0 + $0x40] ss:$8 sps:$4 sm:$0xff]   ;;  %v1039_v36 = vld [vmem:[%s1459_s0 + $0xd0] ss:$8 sps:$4 sm:$0xff]  }
   0xd   :  { %v1040_v37 = vld [vmem:[%s1459_s0 + $0x54] ss:$8 sps:$4 sm:$0xff]   ;;  %v1042_v38 = vld [vmem:[%s1459_s0 + $0xe4] ss:$8 sps:$4 sm:$0xff]   ;;  %v1044_v39 = vld [vmem:[%s1459_s0 + $0x50] ss:$8 sps:$4 sm:$0xff]  }
   0xe   :  { %373 = vmatpush1.bf16.msra.mxu0 %v997_v4  ;;  %980 = vmatpush1.bf16.msra.mxu1 %v997_v4  ;;  %v1045_v40 = vld [vmem:[%s1459_s0 + $0xe0] ss:$8 sps:$4 sm:$0xff]   ;;  %v1046_v41 = vld [vmem:[%s1459_s0 + $0x64] ss:$8 sps:$4 sm:$0xff]   ;;  %v1048_v42 = vld [vmem:[%s1459_s0 + $0xf4] ss:$8 sps:$4 sm:$0xff]  }
   0xf   :  { %374 = vmatprep.subr.bf16.mxu0 %v1064_v0  ;;  %965 = vmatprep.subr.bf16.mxu1 %v1064_v0  ;;  %v1050_v43 = vld [vmem:[%s1459_s0 + $0x60] ss:$8 sps:$4 sm:$0xff]   ;;  %v1051_v44 = vld [vmem:[%s1459_s0 + $0xf0] ss:$8 sps:$4 sm:$0xff]   ;;  %v1052_v45 = vld [vmem:[%s1459_s0 + $0x74] ss:$8 sps:$4 sm:$0xff]  }
  0x10   :  { %v1054_v46 = vld [vmem:[%s1459_s0 + $0x104] ss:$8 sps:$4 sm:$0xff]   ;;  %v1056_v47 = vld [vmem:[%s1459_s0 + $0x70] ss:$8 sps:$4 sm:$0xff]   ;;  %v1057_v48 = vld [vmem:[%s1459_s0 + $0x100] ss:$8 sps:$4 sm:$0xff]  }
  0x11   :  { %v1058_v49 = vld [vmem:[%s1459_s0 + $0x84] ss:$8 sps:$4 sm:$0xff]   ;;  %v1060_v50 = vld [vmem:[%s1459_s0 + $0x114] ss:$8 sps:$4 sm:$0xff]   ;;  %v1062_v51 = vld [vmem:[%s1459_s0 + $0x80] ss:$8 sps:$4 sm:$0xff]  }
  0x12   :  { %375 = vmatpush1.bf16.msra.mxu0 %v998_v5  ;;  %981 = vmatpush1.bf16.msra.mxu1 %v998_v5  ;;  %v1063_v52 = vld [vmem:[%s1459_s0 + $0x110] ss:$8 sps:$4 sm:$0xff]   ;;  %v1276_v53 = vld [vmem:[%s1460_s2] ss:$0 sm:$0xff] }
  0x13   :  { %376 = vmatprep.subr.bf16.mxu0 %v1064_v0  ;;  %966 = vmatprep.subr.bf16.mxu1 %v1064_v0 }
  0x16   :  { %377 = vmatpush1.bf16.msra.mxu0 %v999_v7  ;;  %982 = vmatpush1.bf16.msra.mxu1 %v999_v7 }
  0x17   :  { %378 = vmatprep.subr.bf16.mxu0 %v1064_v0  ;;  %967 = vmatprep.subr.bf16.mxu1 %v1064_v0 }
  0x1a   :  { %379 = vmatpush1.bf16.msra.mxu0 %v1000_v9  ;;  %983 = vmatpush1.bf16.msra.mxu1 %v1000_v9 }
  0x1b   :  { %380 = vmatprep.subr.bf16.mxu0 %v1064_v0  ;;  %968 = vmatprep.subr.bf16.mxu1 %v1064_v0 }
  0x1e   :  { %381 = vmatpush1.bf16.msra.mxu0 %v1001_v10  ;;  %984 = vmatpush1.bf16.msra.mxu1 %v1001_v10 }
  0x1f   :  { %382 = vmatprep.subr.bf16.mxu0 %v1064_v0  ;;  %969 = vmatprep.subr.bf16.mxu1 %v1064_v0 }
  0x22   :  { %383 = vmatpush1.bf16.msra.mxu0 %v1002_v11  ;;  %985 = vmatpush1.bf16.msra.mxu1 %v1002_v11 }
  0x23   :  { %384 = vmatprep.subr.bf16.mxu0 %v1064_v0  ;;  %970 = vmatprep.subr.bf16.mxu1 %v1064_v0 }
  0x26   :  { %385 = vmatpush1.bf16.msra.mxu0 %v1003_v12  ;;  %986 = vmatpush1.bf16.msra.mxu1 %v1003_v12 }
  0x27   :  { %386 = vmatprep.subr.bf16.mxu0 %v1064_v0  ;;  %971 = vmatprep.subr.bf16.mxu1 %v1064_v0 }
  0x2a   :  { %387 = vmatpush1.bf16.msra.mxu0 %v1004_v13  ;;  %987 = vmatpush1.bf16.msra.mxu1 %v1004_v13 }
  0x2b   :  { %388 = vmatprep.subr.bf16.mxu0 %v1064_v0  ;;  %972 = vmatprep.subr.bf16.mxu1 %v1064_v0 }
  0x2e   :  { %389 = vmatpush1.bf16.msra.mxu0 %v1005_v14  ;;  %988 = vmatpush1.bf16.msra.mxu1 %v1005_v14 }
  0x2f   :  { %390 = vmatprep.subr.bf16.mxu0 %v1064_v0  ;;  %973 = vmatprep.subr.bf16.mxu1 %v1064_v0 }
  0x32   :  { %391 = vmatpush1.bf16.msra.mxu0 %v1006_v15  ;;  %989 = vmatpush1.bf16.msra.mxu1 %v1006_v15 }
  0x33   :  { %392 = vmatprep.subr.bf16.mxu0 %v1064_v0  ;;  %974 = vmatprep.subr.bf16.mxu1 %v1064_v0 }
  0x36   :  { %393 = vmatpush1.bf16.msra.mxu0 %v1007_v16  ;;  %990 = vmatpush1.bf16.msra.mxu1 %v1007_v16 }
  0x37   :  { %394 = vmatprep.subr.bf16.mxu0 %v1064_v0  ;;  %975 = vmatprep.subr.bf16.mxu1 %v1064_v0 }
  0x3a   :  { %395 = vmatpush1.bf16.msra.mxu0 %v1008_v17  ;;  %991 = vmatpush1.bf16.msra.mxu1 %v1008_v17 }
  0x3b   :  { %396 = vmatprep.subr.bf16.mxu0 %v1064_v0  ;;  %976 = vmatprep.subr.bf16.mxu1 %v1064_v0 }
  0x3e   :  { %397 = vmatpush1.bf16.msra.mxu0 %v1009_v18  ;;  %992 = vmatpush1.bf16.msra.mxu1 %v1009_v18 }
  0x41   :  { %399 = vmatmul.mubr.bf16.vlgmr.msra.gmra.mrb[0].mxu0 %v1010_v19  ;;  %471 = vmatmul.mubr.bf16.vlgmr.msra.gmra.mrb[0].mxu1 %v1013_v20 }
  0x42   :  { %406 = vmatprep.mubr.bf16.mxu0 %v1016_v21  ;;  %478 = vmatprep.mubr.bf16.mxu1 %v1018_v22 }
  0x49   :  { %407 = vmatmul.mubr.bf16.gmra.mrb[4].mxu0 %v1020_v23  ;;  %479 = vmatmul.mubr.bf16.gmra.mrb[4].mxu1 %v1021_v24 }
  0x4a   :  { %414 = vmatprep.mubr.bf16.mxu0 %v1022_v25  ;;  %486 = vmatprep.mubr.bf16.mxu1 %v1024_v26 }
  0x51   :  { %415 = vmatmul.mubr.bf16.gmra.mrb[8].mxu0 %v1026_v27  ;;  %487 = vmatmul.mubr.bf16.gmra.mrb[8].mxu1 %v1027_v28 }
  0x52   :  { %422 = vmatprep.mubr.bf16.mxu0 %v1028_v29  ;;  %494 = vmatprep.mubr.bf16.mxu1 %v1030_v30 }
  0x59   :  { %423 = vmatmul.mubr.bf16.gmra.mrb[12].mxu0 %v1032_v31  ;;  %495 = vmatmul.mubr.bf16.gmra.mrb[12].mxu1 %v1033_v32 }
  0x5a   :  { %430 = vmatprep.mubr.bf16.mxu0 %v1034_v33  ;;  %502 = vmatprep.mubr.bf16.mxu1 %v1036_v34 }
  0x61   :  { %431 = vmatmul.mubr.bf16.gmra.mrb[16].mxu0 %v1038_v35  ;;  %503 = vmatmul.mubr.bf16.gmra.mrb[16].mxu1 %v1039_v36 }
  0x62   :  { %438 = vmatprep.mubr.bf16.mxu0 %v1040_v37  ;;  %510 = vmatprep.mubr.bf16.mxu1 %v1042_v38 }
  0x69   :  { %439 = vmatmul.mubr.bf16.gmra.mrb[20].mxu0 %v1044_v39  ;;  %511 = vmatmul.mubr.bf16.gmra.mrb[20].mxu1 %v1045_v40 }
  0x6a   :  { %446 = vmatprep.mubr.bf16.mxu0 %v1046_v41  ;;  %518 = vmatprep.mubr.bf16.mxu1 %v1048_v42 }
  0x71   :  { %447 = vmatmul.mubr.bf16.gmra.mrb[24].mxu0 %v1050_v43  ;;  %519 = vmatmul.mubr.bf16.gmra.mrb[24].mxu1 %v1051_v44 }
  0x72   :  { %454 = vmatprep.mubr.bf16.mxu0 %v1052_v45  ;;  %526 = vmatprep.mubr.bf16.mxu1 %v1054_v46 }
  0x79   :  { %455 = vmatmul.mubr.bf16.gmra.mrb[28].mxu0 %v1056_v47  ;;  %527 = vmatmul.mubr.bf16.gmra.mrb[28].mxu1 %v1057_v48 }
  0x7a   :  { %462 = vmatprep.mubr.bf16.mxu0 %v1058_v49  ;;  %534 = vmatprep.mubr.bf16.mxu1 %v1060_v50 }
  0x81   :  { %463 = vmatmul.mubr.bf16.gmra.mrb[32].mxu0 %v1062_v51  ;;  %535 = vmatmul.mubr.bf16.gmra.mrb[32].mxu1 %v1063_v52 }
 0x114   :  { %v400_v54 = vpop.f32.mrb[0].mxu0  ;;  %v472_v55 = vpop.f32.mrb[0].mxu1 }
 0x115   :  { %v401_v56 = vadd.f32 %v1276_v53, %v400_v54  ;;  %v473_v57 = vadd.f32 %v1276_v53, %v472_v55  ;;  %v402_v58 = vpop.f32.mrb[1].mxu0  ;;  %v474_v59 = vpop.f32.mrb[1].mxu1 }
 0x116   :  { %v403_v60 = vpop.f32.mrb[2].mxu0  ;;  %v475_v61 = vpop.f32.mrb[2].mxu1 }
 0x117   :  { %vm543_vm0 = vcmp.gt.f32.partialorder %v401_v56, 0.0  ;;  %v579_v62 = vmul.f32 0.2, %v401_v56  ;;  %vm561_vm1 = vcmp.gt.f32.partialorder %v473_v57, 0.0  ;;  %v597_v63 = vmul.f32 0.2, %v473_v57 }
 0x118   :  { %v404_v0 = vadd.f32 %v1276_v53, %v403_v60  ;;  %v476_v1 = vadd.f32 %v1276_v53, %v475_v61  ;;  %v405_v2 = vpop.f32.mrb[3].mxu0  ;;  %v477_v3 = vpop.f32.mrb[3].mxu1 }
 0x119   :  { %v615_v4 = vsel %vm543_vm0, %v401_v56, %v579_v62  ;;  %v633_v5 = vsel %vm561_vm1, %v473_v57, %v597_v63 }
 0x11a   :  { %v925_v6 = vpack.c.bf16 %v615_v4, %v615_v4  ;;  %v943_v7 = vpack.c.bf16 %v633_v5, %v633_v5  ;;  %vm544_vm3 = vcmp.gt.f32.partialorder %v404_v0, 0.0  ;;  %v580_v8 = vmul.f32 0.2, %v404_v0 }
 0x11b   :  { %vm562_vm4 = vcmp.gt.f32.partialorder %v476_v1, 0.0  ;;  %v598_v9 = vmul.f32 0.2, %v476_v1 }
 0x11c   :  { %796 = vst.msk [vmem:[%s1461_s3] sm:$0xf] %vm795_vm2, %v925_v6  ;;  %814 = vst.msk [vmem:[%s1461_s3 + $0x48] sm:$0xf] %vm795_vm2, %v943_v7  ;;  %v616_v10 = vsel %vm544_vm3, %v404_v0, %v580_v8  ;;  %v408_v11 = vpop.f32.mrb[4].mxu0  ;;  %v480_v12 = vpop.f32.mrb[4].mxu1 }
 0x11d   :  { %v926_v13 = vpack.c.bf16 %v616_v10, %v616_v10  ;;  %v634_v14 = vsel %vm562_vm4, %v476_v1, %v598_v9  ;;  %v409_v15 = vadd.f32 %v1276_v53, %v408_v11  ;;  %v481_v16 = vadd.f32 %v1276_v53, %v480_v12  ;;  %v410_v17 = vpop.f32.mrb[5].mxu0  ;;  %v482_v18 = vpop.f32.mrb[5].mxu1 }
 0x11e   :  { %v944_v19 = vpack.c.bf16 %v634_v14, %v634_v14  ;;  %v411_v20 = vpop.f32.mrb[6].mxu0  ;;  %v483_v21 = vpop.f32.mrb[6].mxu1 }
 0x11f   :  { %797 = vst.msk [vmem:[%s1461_s3 + $0x4] sm:$0xf] %vm795_vm2, %v926_v13  ;;  %vm545_vm5 = vcmp.gt.f32.partialorder %v409_v15, 0.0  ;;  %v581_v22 = vmul.f32 0.2, %v409_v15  ;;  %vm563_vm6 = vcmp.gt.f32.partialorder %v481_v16, 0.0  ;;  %v412_v24 = vadd.f32 %v1276_v53, %v411_v20 }
 0x120   :  { %v599_v23 = vmul.f32 0.2, %v481_v16  ;;  %815 = vst.msk [vmem:[%s1461_s3 + $0x4c] sm:$0xf] %vm795_vm2, %v944_v19  ;;  %v484_v25 = vadd.f32 %v1276_v53, %v483_v21  ;;  %v413_v26 = vpop.f32.mrb[7].mxu0  ;;  %v485_v27 = vpop.f32.mrb[7].mxu1 }
 0x121   :  { %v617_v28 = vsel %vm545_vm5, %v409_v15, %v581_v22  ;;  %vm546_vm7 = vcmp.gt.f32.partialorder %v412_v24, 0.0  ;;  %v582_v32 = vmul.f32 0.2, %v412_v24 }
 0x122   :  { %v635_v29 = vsel %vm563_vm6, %v481_v16, %v599_v23  ;;  %v927_v30 = vpack.c.bf16 %v617_v28, %v617_v28  ;;  %vm564_vm8 = vcmp.gt.f32.partialorder %v484_v25, 0.0  ;;  %v600_v33 = vmul.f32 0.2, %v484_v25 }
 0x123   :  { %v945_v31 = vpack.c.bf16 %v635_v29, %v635_v29  ;;  %v618_v34 = vsel %vm546_vm7, %v412_v24, %v582_v32 }
 0x124   :  { %798 = vst.msk [vmem:[%s1461_s3 + $0x8] sm:$0xf] %vm795_vm2, %v927_v30  ;;  %v416_v35 = vpop.f32.mrb[8].mxu0  ;;  %v488_v36 = vpop.f32.mrb[8].mxu1  ;;  %v928_v37 = vpack.c.bf16 %v618_v34, %v618_v34  ;;  %v636_v38 = vsel %vm564_vm8, %v484_v25, %v600_v33 }
 0x125   :  { %816 = vst.msk [vmem:[%s1461_s3 + $0x50] sm:$0xf] %vm795_vm2, %v945_v31  ;;  %v417_v39 = vadd.f32 %v1276_v53, %v416_v35  ;;  %v489_v40 = vadd.f32 %v1276_v53, %v488_v36  ;;  %v418_v41 = vpop.f32.mrb[9].mxu0  ;;  %v490_v42 = vpop.f32.mrb[9].mxu1  ;;  %v946_v43 = vpack.c.bf16 %v636_v38, %v636_v38 }
 0x126   :  { %v419_v44 = vpop.f32.mrb[10].mxu0  ;;  %v491_v45 = vpop.f32.mrb[10].mxu1  ;;  %799 = vst.msk [vmem:[%s1461_s3 + $0xc] sm:$0xf] %vm795_vm2, %v928_v37 }
 0x127   :  { %vm547_vm9 = vcmp.gt.f32.partialorder %v417_v39, 0.0  ;;  %v583_v46 = vmul.f32 0.2, %v417_v39  ;;  %vm565_vm10 = vcmp.gt.f32.partialorder %v489_v40, 0.0  ;;  %v601_v47 = vmul.f32 0.2, %v489_v40 }
 0x128   :  { %817 = vst.msk [vmem:[%s1461_s3 + $0x54] sm:$0xf] %vm795_vm2, %v946_v43  ;;  %v420_v48 = vadd.f32 %v1276_v53, %v419_v44  ;;  %v492_v49 = vadd.f32 %v1276_v53, %v491_v45  ;;  %v421_v50 = vpop.f32.mrb[11].mxu0  ;;  %v493_v51 = vpop.f32.mrb[11].mxu1 }
 0x129   :  { %v619_v52 = vsel %vm547_vm9, %v417_v39, %v583_v46  ;;  %v637_v54 = vsel %vm565_vm10, %v489_v40, %v601_v47 }
 0x12a   :  { %v929_v55 = vpack.c.bf16 %v619_v52, %v619_v52  ;;  %v947_v56 = vpack.c.bf16 %v637_v54, %v637_v54  ;;  %vm548_vm11 = vcmp.gt.f32.partialorder %v420_v48, 0.0  ;;  %v584_v57 = vmul.f32 0.2, %v420_v48 }
 0x12b   :  { %vm566_vm12 = vcmp.gt.f32.partialorder %v492_v49, 0.0  ;;  %v602_v58 = vmul.f32 0.2, %v492_v49 }
 0x12c   :  { %800 = vst.msk [vmem:[%s1461_s3 + $0x10] sm:$0xf] %vm795_vm2, %v929_v55  ;;  %818 = vst.msk [vmem:[%s1461_s3 + $0x58] sm:$0xf] %vm795_vm2, %v947_v56  ;;  %v620_v59 = vsel %vm548_vm11, %v420_v48, %v584_v57  ;;  %v424_v60 = vpop.f32.mrb[12].mxu0  ;;  %v496_v61 = vpop.f32.mrb[12].mxu1 }
 0x12d   :  { %v930_v62 = vpack.c.bf16 %v620_v59, %v620_v59  ;;  %v638_v63 = vsel %vm566_vm12, %v492_v49, %v602_v58  ;;  %v425_v0 = vadd.f32 %v1276_v53, %v424_v60  ;;  %v497_v1 = vadd.f32 %v1276_v53, %v496_v61  ;;  %v426_v2 = vpop.f32.mrb[13].mxu0  ;;  %v498_v3 = vpop.f32.mrb[13].mxu1 }
 0x12e   :  { %v948_v4 = vpack.c.bf16 %v638_v63, %v638_v63  ;;  %v427_v5 = vpop.f32.mrb[14].mxu0  ;;  %v499_v6 = vpop.f32.mrb[14].mxu1 }
 0x12f   :  { %801 = vst.msk [vmem:[%s1461_s3 + $0x14] sm:$0xf] %vm795_vm2, %v930_v62  ;;  %vm549_vm13 = vcmp.gt.f32.partialorder %v425_v0, 0.0  ;;  %v585_v7 = vmul.f32 0.2, %v425_v0  ;;  %vm567_vm14 = vcmp.gt.f32.partialorder %v497_v1, 0.0  ;;  %v428_v9 = vadd.f32 %v1276_v53, %v427_v5 }
 0x130   :  { %v603_v8 = vmul.f32 0.2, %v497_v1  ;;  %819 = vst.msk [vmem:[%s1461_s3 + $0x5c] sm:$0xf] %vm795_vm2, %v948_v4  ;;  %v500_v10 = vadd.f32 %v1276_v53, %v499_v6  ;;  %v429_v11 = vpop.f32.mrb[15].mxu0  ;;  %v501_v12 = vpop.f32.mrb[15].mxu1 }
 0x131   :  { %v621_v13 = vsel %vm549_vm13, %v425_v0, %v585_v7  ;;  %vm550_vm15 = vcmp.gt.f32.partialorder %v428_v9, 0.0  ;;  %v586_v17 = vmul.f32 0.2, %v428_v9 }
 0x132   :  { %v639_v14 = vsel %vm567_vm14, %v497_v1, %v603_v8  ;;  %v931_v15 = vpack.c.bf16 %v621_v13, %v621_v13  ;;  %vm568_vm0 = vcmp.gt.f32.partialorder %v500_v10, 0.0  ;;  %v604_v18 = vmul.f32 0.2, %v500_v10 }
 0x133   :  { %v949_v16 = vpack.c.bf16 %v639_v14, %v639_v14  ;;  %v622_v19 = vsel %vm550_vm15, %v428_v9, %v586_v17 }
 0x134   :  { %802 = vst.msk [vmem:[%s1461_s3 + $0x18] sm:$0xf] %vm795_vm2, %v931_v15  ;;  %v432_v20 = vpop.f32.mrb[16].mxu0  ;;  %v504_v21 = vpop.f32.mrb[16].mxu1  ;;  %v932_v22 = vpack.c.bf16 %v622_v19, %v622_v19  ;;  %v640_v23 = vsel %vm568_vm0, %v500_v10, %v604_v18 }
 0x135   :  { %820 = vst.msk [vmem:[%s1461_s3 + $0x60] sm:$0xf] %vm795_vm2, %v949_v16  ;;  %v433_v24 = vadd.f32 %v1276_v53, %v432_v20  ;;  %v505_v25 = vadd.f32 %v1276_v53, %v504_v21  ;;  %v434_v26 = vpop.f32.mrb[17].mxu0  ;;  %v506_v27 = vpop.f32.mrb[17].mxu1  ;;  %v950_v28 = vpack.c.bf16 %v640_v23, %v640_v23 }
 0x136   :  { %v435_v29 = vpop.f32.mrb[18].mxu0  ;;  %v507_v30 = vpop.f32.mrb[18].mxu1  ;;  %803 = vst.msk [vmem:[%s1461_s3 + $0x1c] sm:$0xf] %vm795_vm2, %v932_v22 }
 0x137   :  { %vm551_vm1 = vcmp.gt.f32.partialorder %v433_v24, 0.0  ;;  %v587_v31 = vmul.f32 0.2, %v433_v24  ;;  %vm569_vm3 = vcmp.gt.f32.partialorder %v505_v25, 0.0  ;;  %v605_v32 = vmul.f32 0.2, %v505_v25 }
 0x138   :  { %821 = vst.msk [vmem:[%s1461_s3 + $0x64] sm:$0xf] %vm795_vm2, %v950_v28  ;;  %v436_v33 = vadd.f32 %v1276_v53, %v435_v29  ;;  %v508_v34 = vadd.f32 %v1276_v53, %v507_v30  ;;  %v437_v35 = vpop.f32.mrb[19].mxu0  ;;  %v509_v36 = vpop.f32.mrb[19].mxu1 }
 0x139   :  { %v623_v37 = vsel %vm551_vm1, %v433_v24, %v587_v31  ;;  %v641_v38 = vsel %vm569_vm3, %v505_v25, %v605_v32 }
 0x13a   :  { %v933_v39 = vpack.c.bf16 %v623_v37, %v623_v37  ;;  %v951_v40 = vpack.c.bf16 %v641_v38, %v641_v38  ;;  %vm552_vm4 = vcmp.gt.f32.partialorder %v436_v33, 0.0  ;;  %v588_v41 = vmul.f32 0.2, %v436_v33 }
 0x13b   :  { %vm570_vm5 = vcmp.gt.f32.partialorder %v508_v34, 0.0  ;;  %v606_v42 = vmul.f32 0.2, %v508_v34 }
 0x13c   :  { %804 = vst.msk [vmem:[%s1461_s3 + $0x20] sm:$0xf] %vm795_vm2, %v933_v39  ;;  %822 = vst.msk [vmem:[%s1461_s3 + $0x68] sm:$0xf] %vm795_vm2, %v951_v40  ;;  %v624_v43 = vsel %vm552_vm4, %v436_v33, %v588_v41  ;;  %v440_v44 = vpop.f32.mrb[20].mxu0  ;;  %v512_v45 = vpop.f32.mrb[20].mxu1 }
 0x13d   :  { %v934_v46 = vpack.c.bf16 %v624_v43, %v624_v43  ;;  %v642_v47 = vsel %vm570_vm5, %v508_v34, %v606_v42  ;;  %v441_v48 = vadd.f32 %v1276_v53, %v440_v44  ;;  %v513_v49 = vadd.f32 %v1276_v53, %v512_v45  ;;  %v442_v50 = vpop.f32.mrb[21].mxu0  ;;  %v514_v51 = vpop.f32.mrb[21].mxu1 }
 0x13e   :  { %v952_v52 = vpack.c.bf16 %v642_v47, %v642_v47  ;;  %v443_v54 = vpop.f32.mrb[22].mxu0  ;;  %v515_v55 = vpop.f32.mrb[22].mxu1 }
 0x13f   :  { %805 = vst.msk [vmem:[%s1461_s3 + $0x24] sm:$0xf] %vm795_vm2, %v934_v46  ;;  %vm553_vm6 = vcmp.gt.f32.partialorder %v441_v48, 0.0  ;;  %v589_v56 = vmul.f32 0.2, %v441_v48  ;;  %vm571_vm7 = vcmp.gt.f32.partialorder %v513_v49, 0.0  ;;  %v444_v58 = vadd.f32 %v1276_v53, %v443_v54 }
 0x140   :  { %v607_v57 = vmul.f32 0.2, %v513_v49  ;;  %823 = vst.msk [vmem:[%s1461_s3 + $0x6c] sm:$0xf] %vm795_vm2, %v952_v52  ;;  %v516_v59 = vadd.f32 %v1276_v53, %v515_v55  ;;  %v445_v60 = vpop.f32.mrb[23].mxu0  ;;  %v517_v61 = vpop.f32.mrb[23].mxu1 }
 0x141   :  { %v625_v62 = vsel %vm553_vm6, %v441_v48, %v589_v56  ;;  %vm554_vm8 = vcmp.gt.f32.partialorder %v444_v58, 0.0  ;;  %v590_v2 = vmul.f32 0.2, %v444_v58 }
 0x142   :  { %v643_v63 = vsel %vm571_vm7, %v513_v49, %v607_v57  ;;  %v935_v0 = vpack.c.bf16 %v625_v62, %v625_v62  ;;  %vm572_vm9 = vcmp.gt.f32.partialorder %v516_v59, 0.0  ;;  %v608_v3 = vmul.f32 0.2, %v516_v59 }
 0x143   :  { %v953_v1 = vpack.c.bf16 %v643_v63, %v643_v63  ;;  %v626_v4 = vsel %vm554_vm8, %v444_v58, %v590_v2 }
 0x144   :  { %806 = vst.msk [vmem:[%s1461_s3 + $0x28] sm:$0xf] %vm795_vm2, %v935_v0  ;;  %v448_v5 = vpop.f32.mrb[24].mxu0  ;;  %v520_v6 = vpop.f32.mrb[24].mxu1  ;;  %v936_v7 = vpack.c.bf16 %v626_v4, %v626_v4  ;;  %v644_v8 = vsel %vm572_vm9, %v516_v59, %v608_v3 }
 0x145   :  { %824 = vst.msk [vmem:[%s1461_s3 + $0x70] sm:$0xf] %vm795_vm2, %v953_v1  ;;  %v449_v9 = vadd.f32 %v1276_v53, %v448_v5  ;;  %v521_v10 = vadd.f32 %v1276_v53, %v520_v6  ;;  %v450_v11 = vpop.f32.mrb[25].mxu0  ;;  %v522_v12 = vpop.f32.mrb[25].mxu1  ;;  %v954_v13 = vpack.c.bf16 %v644_v8, %v644_v8 }
 0x146   :  { %v451_v14 = vpop.f32.mrb[26].mxu0  ;;  %v523_v15 = vpop.f32.mrb[26].mxu1  ;;  %807 = vst.msk [vmem:[%s1461_s3 + $0x2c] sm:$0xf] %vm795_vm2, %v936_v7 }
 0x147   :  { %vm555_vm10 = vcmp.gt.f32.partialorder %v449_v9, 0.0  ;;  %v591_v16 = vmul.f32 0.2, %v449_v9  ;;  %vm573_vm11 = vcmp.gt.f32.partialorder %v521_v10, 0.0  ;;  %v609_v17 = vmul.f32 0.2, %v521_v10 }
 0x148   :  { %825 = vst.msk [vmem:[%s1461_s3 + $0x74] sm:$0xf] %vm795_vm2, %v954_v13  ;;  %v452_v18 = vadd.f32 %v1276_v53, %v451_v14  ;;  %v524_v19 = vadd.f32 %v1276_v53, %v523_v15  ;;  %v453_v20 = vpop.f32.mrb[27].mxu0  ;;  %v525_v21 = vpop.f32.mrb[27].mxu1 }
 0x149   :  { %v627_v22 = vsel %vm555_vm10, %v449_v9, %v591_v16  ;;  %v645_v23 = vsel %vm573_vm11, %v521_v10, %v609_v17 }
 0x14a   :  { %v937_v24 = vpack.c.bf16 %v627_v22, %v627_v22  ;;  %v955_v25 = vpack.c.bf16 %v645_v23, %v645_v23  ;;  %vm556_vm12 = vcmp.gt.f32.partialorder %v452_v18, 0.0  ;;  %v592_v26 = vmul.f32 0.2, %v452_v18 }
 0x14b   :  { %vm574_vm13 = vcmp.gt.f32.partialorder %v524_v19, 0.0  ;;  %v610_v27 = vmul.f32 0.2, %v524_v19 }
 0x14c   :  { %808 = vst.msk [vmem:[%s1461_s3 + $0x30] sm:$0xf] %vm795_vm2, %v937_v24  ;;  %826 = vst.msk [vmem:[%s1461_s3 + $0x78] sm:$0xf] %vm795_vm2, %v955_v25  ;;  %v628_v28 = vsel %vm556_vm12, %v452_v18, %v592_v26  ;;  %v456_v29 = vpop.f32.mrb[28].mxu0  ;;  %v528_v30 = vpop.f32.mrb[28].mxu1 }
 0x14d   :  { %v938_v31 = vpack.c.bf16 %v628_v28, %v628_v28  ;;  %v646_v32 = vsel %vm574_vm13, %v524_v19, %v610_v27  ;;  %v457_v33 = vadd.f32 %v1276_v53, %v456_v29  ;;  %v529_v34 = vadd.f32 %v1276_v53, %v528_v30  ;;  %v458_v35 = vpop.f32.mrb[29].mxu0  ;;  %v530_v36 = vpop.f32.mrb[29].mxu1 }
 0x14e   :  { %v956_v37 = vpack.c.bf16 %v646_v32, %v646_v32  ;;  %v459_v38 = vpop.f32.mrb[30].mxu0  ;;  %v531_v39 = vpop.f32.mrb[30].mxu1 }
 0x14f   :  { %809 = vst.msk [vmem:[%s1461_s3 + $0x34] sm:$0xf] %vm795_vm2, %v938_v31  ;;  %vm557_vm14 = vcmp.gt.f32.partialorder %v457_v33, 0.0  ;;  %v593_v40 = vmul.f32 0.2, %v457_v33  ;;  %vm575_vm15 = vcmp.gt.f32.partialorder %v529_v34, 0.0  ;;  %v460_v42 = vadd.f32 %v1276_v53, %v459_v38 }
 0x150   :  { %v611_v41 = vmul.f32 0.2, %v529_v34  ;;  %827 = vst.msk [vmem:[%s1461_s3 + $0x7c] sm:$0xf] %vm795_vm2, %v956_v37  ;;  %v532_v43 = vadd.f32 %v1276_v53, %v531_v39  ;;  %v461_v44 = vpop.f32.mrb[31].mxu0  ;;  %v533_v45 = vpop.f32.mrb[31].mxu1 }
 0x151   :  { %v629_v46 = vsel %vm557_vm14, %v457_v33, %v593_v40  ;;  %vm558_vm0 = vcmp.gt.f32.partialorder %v460_v42, 0.0  ;;  %v594_v50 = vmul.f32 0.2, %v460_v42 }
 0x152   :  { %v647_v47 = vsel %vm575_vm15, %v529_v34, %v611_v41  ;;  %v939_v48 = vpack.c.bf16 %v629_v46, %v629_v46  ;;  %vm576_vm1 = vcmp.gt.f32.partialorder %v532_v43, 0.0  ;;  %v612_v51 = vmul.f32 0.2, %v532_v43 }
 0x153   :  { %v957_v49 = vpack.c.bf16 %v647_v47, %v647_v47  ;;  %v630_v52 = vsel %vm558_vm0, %v460_v42, %v594_v50 }
 0x154   :  { %810 = vst.msk [vmem:[%s1461_s3 + $0x38] sm:$0xf] %vm795_vm2, %v939_v48  ;;  %v464_v54 = vpop.f32.mrb[32].mxu0  ;;  %v536_v55 = vpop.f32.mrb[32].mxu1  ;;  %v940_v56 = vpack.c.bf16 %v630_v52, %v630_v52  ;;  %v648_v57 = vsel %vm576_vm1, %v532_v43, %v612_v51 }
 0x155   :  { %828 = vst.msk [vmem:[%s1461_s3 + $0x80] sm:$0xf] %vm795_vm2, %v957_v49  ;;  %v465_v58 = vadd.f32 %v1276_v53, %v464_v54  ;;  %v537_v59 = vadd.f32 %v1276_v53, %v536_v55  ;;  %v466_v60 = vpop.f32.mrb[33].mxu0  ;;  %v538_v61 = vpop.f32.mrb[33].mxu1  ;;  %v958_v62 = vpack.c.bf16 %v648_v57, %v648_v57 }
 0x156   :  { %v467_v63 = vpop.f32.mrb[34].mxu0  ;;  %v539_v0 = vpop.f32.mrb[34].mxu1  ;;  %811 = vst.msk [vmem:[%s1461_s3 + $0x3c] sm:$0xf] %vm795_vm2, %v940_v56 }
 0x157   :  { %vm559_vm3 = vcmp.gt.f32.partialorder %v465_v58, 0.0  ;;  %v595_v1 = vmul.f32 0.2, %v465_v58  ;;  %vm577_vm4 = vcmp.gt.f32.partialorder %v537_v59, 0.0  ;;  %v613_v2 = vmul.f32 0.2, %v537_v59 }
 0x158   :  { %829 = vst.msk [vmem:[%s1461_s3 + $0x84] sm:$0xf] %vm795_vm2, %v958_v62  ;;  %v468_v3 = vadd.f32 %v1276_v53, %v467_v63  ;;  %v540_v4 = vadd.f32 %v1276_v53, %v539_v0  ;;  %v469_v5 = vpop.f32.mrb[35].mxu0  ;;  %v541_v6 = vpop.f32.mrb[35].mxu1 }
 0x159   :  { %v631_v7 = vsel %vm559_vm3, %v465_v58, %v595_v1  ;;  %v649_v8 = vsel %vm577_vm4, %v537_v59, %v613_v2 }
 0x15a   :  { %v941_v9 = vpack.c.bf16 %v631_v7, %v631_v7  ;;  %v959_v10 = vpack.c.bf16 %v649_v8, %v649_v8  ;;  %vm560_vm5 = vcmp.gt.f32.partialorder %v468_v3, 0.0  ;;  %v596_v11 = vmul.f32 0.2, %v468_v3 }
 0x15b   :  { %vm578_vm6 = vcmp.gt.f32.partialorder %v540_v4, 0.0  ;;  %v614_v12 = vmul.f32 0.2, %v540_v4 }
 0x15c   :  { %812 = vst.msk [vmem:[%s1461_s3 + $0x40] sm:$0xf] %vm795_vm2, %v941_v9  ;;  %830 = vst.msk [vmem:[%s1461_s3 + $0x88] sm:$0xf] %vm795_vm2, %v959_v10  ;;  %v632_v53 = vsel %vm560_vm5, %v468_v3, %v596_v11 }
 0x15d   :  { %v942_v13 = vpack.c.bf16 %v632_v53, %v632_v53  ;;  %v650_v14 = vsel %vm578_vm6, %v540_v4, %v614_v12 }
 0x15e   :  { %v960_v15 = vpack.c.bf16 %v650_v14, %v650_v14 }
 0x15f   :  { %813 = vst.msk [vmem:[%s1461_s3 + $0x44] sm:$0xf] %vm795_vm2, %v942_v13 }
 0x160   :  { %831 = vst.msk [vmem:[%s1461_s3 + $0x8c] sm:$0xf] %vm795_vm2, %v960_v15 }

// kernel: conv_discriminator_forward.5
= control target key start
LH: loop header
LB: loop body
LE: loop exit
PB: predicated region body
PF: predicated region fallthrough
CT: control target
= control target key end

     0   :  { %v2224_v0 = vmov 0   ;;  %vm2226_vm0 = vmmov 0   ;;  %vm1463_vm1 = vcmask 1041409   ;;  %vm1598_vm3 = vcmask 523264   ;;  %s2921_s1 = inlined_call_operand.vmem [shape: f32[800,1], index: 1, kind: input, shape index: {}]   ;;  %s2922_s0 = inlined_call_operand.vmem [shape: bf16[2,800,128], index: 0, kind: input, shape index: {}]   ;;  %s2923_s2 = inlined_call_operand.vmem [shape: bf16[128,64], index: 2, kind: input, shape index: {}]   ;;  %s2924_s4 = inlined_call_operand.vmem [shape: bf16[64,128], index: 4, kind: input, shape index: {}]   ;;  %s2925_s3 = inlined_call_operand.vmem [shape: f32[1,64], index: 3, kind: input, shape index: {}]   ;;  %s2926_s5 = inlined_call_operand.vmem [shape: f32[1,128], index: 5, kind: input, shape index: {}]   ;;  %s2927_s6 = inlined_call_operand.vmem [shape: f32[2,128], index: 6, kind: output, shape index: {}]  }
   0x1   :  { %2211 = vset.pattern.permute.xlu1 %v2224_v0  ;;  %2210 = vset.pattern.permute.xlu0 %v2224_v0  ;;  %v426_v1 = vld [vmem:[%s2921_s1 + $0x10] sm:$0xff]  ;;  %v424_v2 = vld [vmem:[%s2921_s1] sm:$0xff]  ;;  %v427_v3 = vld [vmem:[%s2921_s1 + $0x18] sm:$0xff] }
   0x2   :  { %536 = vperm.xlu1 %2211, %v426_v1   ;;  %526 = vperm.xlu0 %2210, %v424_v2   ;;  %v425_v4 = vld [vmem:[%s2921_s1 + $0x8] sm:$0xff]  ;;  %v428_v6 = vld [vmem:[%s2921_s1 + $0x20] sm:$0xff]  ;;  %v431_v7 = vld [vmem:[%s2921_s1 + $0x38] sm:$0xff] }
   0x3   :  { %v429_v5 = vld [vmem:[%s2921_s1 + $0x28] sm:$0xff]  ;;  %v430_v8 = vld [vmem:[%s2921_s1 + $0x30] sm:$0xff]  ;;  %v432_v10 = vld [vmem:[%s2921_s1 + $0x40] sm:$0xff] }
   0x4   :  { %v433_v9 = vld [vmem:[%s2921_s1 + $0x48] sm:$0xff]  ;;  %v435_v11 = vld [vmem:[%s2921_s1 + $0x58] sm:$0xff]  ;;  %v434_v12 = vld [vmem:[%s2921_s1 + $0x50] sm:$0xff] }
   0x5   :  { %v437_v13 = vld [vmem:[%s2921_s1 + $0x68] sm:$0xff]  ;;  %v436_v14 = vld [vmem:[%s2921_s1 + $0x60] sm:$0xff]  ;;  %v439_v15 = vld [vmem:[%s2921_s1 + $0x78] sm:$0xff] }
   0x6   :  { %541 = vperm.xlu1 %2211, %v427_v3   ;;  %531 = vperm.xlu0 %2210, %v425_v4   ;;  %v438_v16 = vld [vmem:[%s2921_s1 + $0x70] sm:$0xff]  ;;  %v441_v17 = vld [vmem:[%s2921_s1 + $0x88] sm:$0xff]  ;;  %v440_v18 = vld [vmem:[%s2921_s1 + $0x80] sm:$0xff] }
   0x7   :  { %v443_v19 = vld [vmem:[%s2921_s1 + $0x98] sm:$0xff]  ;;  %v442_v20 = vld [vmem:[%s2921_s1 + $0x90] sm:$0xff]  ;;  %v445_v21 = vld [vmem:[%s2921_s1 + $0xa8] sm:$0xff] }
   0x8   :  { %v444_v22 = vld [vmem:[%s2921_s1 + $0xa0] sm:$0xff]  ;;  %v447_v23 = vld [vmem:[%s2921_s1 + $0xb8] sm:$0xff]  ;;  %v446_v24 = vld [vmem:[%s2921_s1 + $0xb0] sm:$0xff] }
   0x9   :  { %v449_v25 = vld [vmem:[%s2921_s1 + $0xc8] sm:$0xff]  ;;  %v448_v26 = vld [vmem:[%s2921_s1 + $0xc0] sm:$0xff]  ;;  %v451_v27 = vld [vmem:[%s2921_s1 + $0xd8] sm:$0xff] }
   0xa   :  { %551 = vperm.xlu1 %2211, %v429_v5   ;;  %546 = vperm.xlu0 %2210, %v428_v6   ;;  %v450_v28 = vld [vmem:[%s2921_s1 + $0xd0] sm:$0xff]  ;;  %v453_v29 = vld [vmem:[%s2921_s1 + $0xe8] sm:$0xff]  ;;  %v452_v30 = vld [vmem:[%s2921_s1 + $0xe0] sm:$0xff] }
   0xb   :  { %v455_v31 = vld [vmem:[%s2921_s1 + $0xf8] sm:$0xff]  ;;  %v454_v32 = vld [vmem:[%s2921_s1 + $0xf0] sm:$0xff]  ;;  %v457_v33 = vld [vmem:[%s2921_s1 + $0x108] sm:$0xff] }
   0xc   :  { %v456_v34 = vld [vmem:[%s2921_s1 + $0x100] sm:$0xff]  ;;  %v459_v35 = vld [vmem:[%s2921_s1 + $0x118] sm:$0xff]  ;;  %v458_v36 = vld [vmem:[%s2921_s1 + $0x110] sm:$0xff] }
   0xd   :  { %v461_v37 = vld [vmem:[%s2921_s1 + $0x128] sm:$0xff]  ;;  %v460_v38 = vld [vmem:[%s2921_s1 + $0x120] sm:$0xff]  ;;  %v463_v39 = vld [vmem:[%s2921_s1 + $0x138] sm:$0xff] }
   0xe   :  { %561 = vperm.xlu1 %2211, %v431_v7   ;;  %556 = vperm.xlu0 %2210, %v430_v8   ;;  %v462_v40 = vld [vmem:[%s2921_s1 + $0x130] sm:$0xff]  ;;  %v465_v41 = vld [vmem:[%s2921_s1 + $0x148] sm:$0xff]  ;;  %v464_v42 = vld [vmem:[%s2921_s1 + $0x140] sm:$0xff] }
   0xf   :  { %v467_v43 = vld [vmem:[%s2921_s1 + $0x158] sm:$0xff]  ;;  %v466_v44 = vld [vmem:[%s2921_s1 + $0x150] sm:$0xff]  ;;  %v469_v45 = vld [vmem:[%s2921_s1 + $0x168] sm:$0xff] }
  0x10   :  { %v468_v46 = vld [vmem:[%s2921_s1 + $0x160] sm:$0xff]  ;;  %v471_v47 = vld [vmem:[%s2921_s1 + $0x178] sm:$0xff]  ;;  %v470_v48 = vld [vmem:[%s2921_s1 + $0x170] sm:$0xff] }
  0x11   :  { %v473_v49 = vld [vmem:[%s2921_s1 + $0x188] sm:$0xff]  ;;  %v472_v50 = vld [vmem:[%s2921_s1 + $0x180] sm:$0xff]  ;;  %v475_v51 = vld [vmem:[%s2921_s1 + $0x198] sm:$0xff] }
  0x12   :  { %571 = vperm.xlu1 %2211, %v433_v9   ;;  %566 = vperm.xlu0 %2210, %v432_v10   ;;  %v474_v52 = vld [vmem:[%s2921_s1 + $0x190] sm:$0xff]  ;;  %v477_v53 = vld [vmem:[%s2921_s1 + $0x1a8] sm:$0xff]  ;;  %v476_v54 = vld [vmem:[%s2921_s1 + $0x1a0] sm:$0xff] }
  0x13   :  { %v479_v55 = vld [vmem:[%s2921_s1 + $0x1b8] sm:$0xff]  ;;  %v478_v56 = vld [vmem:[%s2921_s1 + $0x1b0] sm:$0xff]  ;;  %v481_v57 = vld [vmem:[%s2921_s1 + $0x1c8] sm:$0xff] }
  0x14   :  { %v480_v58 = vld [vmem:[%s2921_s1 + $0x1c0] sm:$0xff]  ;;  %v483_v59 = vld [vmem:[%s2921_s1 + $0x1d8] sm:$0xff]  ;;  %v482_v60 = vld [vmem:[%s2921_s1 + $0x1d0] sm:$0xff] }
  0x15   :  { %v485_v61 = vld [vmem:[%s2921_s1 + $0x1e8] sm:$0xff]  ;;  %v484_v62 = vld [vmem:[%s2921_s1 + $0x1e0] sm:$0xff]  ;;  %v487_v63 = vld [vmem:[%s2921_s1 + $0x1f8] sm:$0xff] }
  0x16   :  { %581 = vperm.xlu1 %2211, %v435_v11   ;;  %576 = vperm.xlu0 %2210, %v434_v12   ;;  %v486_v0 = vld [vmem:[%s2921_s1 + $0x1f0] sm:$0xff]  ;;  %v1663_v1 = vld [vmem:[%s2922_s0] sm:$0xff]   ;;  %v489_v3 = vld [vmem:[%s2921_s1 + $0x208] sm:$0xff] }
  0x17   :  { %v2111_v2 = vld [vmem:[%s2922_s0 + $0x190] sm:$0xff]   ;;  %v488_v4 = vld [vmem:[%s2921_s1 + $0x200] sm:$0xff]  ;;  %v2062_v6 = vld [vmem:[%s2922_s0 + $0x8] sm:$0xff]   ;;  %v1664_v9 = vunpack.c.l.bf16 %v1663_v1  ;;  %v1665_v11 = vunpack.c.h.bf16 %v1663_v1 }
  0x18   :  { %v2112_v7 = vld [vmem:[%s2922_s0 + $0x198] sm:$0xff]   ;;  %v1864_v10 = vunpack.c.l.bf16 %v2111_v2  ;;  %v1865_v12 = vunpack.c.h.bf16 %v2111_v2  ;;  %v497_v1 = vld [vmem:[%s2921_s1 + $0x248] sm:$0xff] }
  0x1a   :  { %591 = vperm.xlu1 %2211, %v437_v13   ;;  %586 = vperm.xlu0 %2210, %v436_v14   ;;  %v491_v13 = vld [vmem:[%s2921_s1 + $0x218] sm:$0xff]  ;;  %v1668_v14 = vunpack.c.l.bf16 %v2062_v6 }
  0x1e   :  { %601 = vperm.xlu1 %2211, %v439_v15   ;;  %596 = vperm.xlu0 %2210, %v438_v16   ;;  %v1868_v15 = vunpack.c.l.bf16 %v2112_v7  ;;  %v490_v16 = vld [vmem:[%s2921_s1 + $0x210] sm:$0xff] }
  0x22   :  { %611 = vperm.xlu1 %2211, %v441_v17   ;;  %606 = vperm.xlu0 %2210, %v440_v18   ;;  %v2063_v17 = vld [vmem:[%s2922_s0 + $0x10] sm:$0xff]   ;;  %v2113_v18 = vld [vmem:[%s2922_s0 + $0x1a0] sm:$0xff]  }
  0x26   :  { %621 = vperm.xlu1 %2211, %v443_v19   ;;  %616 = vperm.xlu0 %2210, %v442_v20   ;;  %v1669_v20 = vunpack.c.h.bf16 %v2062_v6  ;;  %v496_v6 = vld [vmem:[%s2921_s1 + $0x240] sm:$0xff] }
  0x2a   :  { %631 = vperm.xlu1 %2211, %v445_v21   ;;  %626 = vperm.xlu0 %2210, %v444_v22   ;;  %v1869_v21 = vunpack.c.h.bf16 %v2112_v7  ;;  %v2066_v7 = vld [vmem:[%s2922_s0 + $0x28] sm:$0xff]  }
  0x2e   :  { %641 = vperm.xlu1 %2211, %v447_v23   ;;  %636 = vperm.xlu0 %2210, %v446_v24  }
  0x32   :  { %651 = vperm.xlu1 %2211, %v449_v25   ;;  %646 = vperm.xlu0 %2210, %v448_v26  }
  0x36   :  { %661 = vperm.xlu1 %2211, %v451_v27   ;;  %656 = vperm.xlu0 %2210, %v450_v28   ;;  %v1672_v27 = vunpack.c.l.bf16 %v2063_v17  ;;  %v1872_v28 = vunpack.c.l.bf16 %v2113_v18 }
  0x3a   :  { %671 = vperm.xlu1 %2211, %v453_v29   ;;  %666 = vperm.xlu0 %2210, %v452_v30   ;;  %v493_v29 = vld [vmem:[%s2921_s1 + $0x228] sm:$0xff] }
  0x3e   :  { %681 = vperm.xlu1 %2211, %v455_v31   ;;  %676 = vperm.xlu0 %2210, %v454_v32  }
  0x42   :  { %691 = vperm.xlu1 %2211, %v457_v33   ;;  %686 = vperm.xlu0 %2210, %v456_v34   ;;  %v492_v34 = vld [vmem:[%s2921_s1 + $0x220] sm:$0xff] }
  0x46   :  { %701 = vperm.xlu1 %2211, %v459_v35   ;;  %696 = vperm.xlu0 %2210, %v458_v36   ;;  %v2064_v35 = vld [vmem:[%s2922_s0 + $0x18] sm:$0xff]   ;;  %v2114_v36 = vld [vmem:[%s2922_s0 + $0x1a8] sm:$0xff]  }
  0x4a   :  { %711 = vperm.xlu1 %2211, %v461_v37   ;;  %706 = vperm.xlu0 %2210, %v460_v38   ;;  %v1673_v38 = vunpack.c.h.bf16 %v2063_v17  ;;  %v1684_v17 = vunpack.c.l.bf16 %v2066_v7 }
  0x4e   :  { %721 = vperm.xlu1 %2211, %v463_v39   ;;  %716 = vperm.xlu0 %2210, %v462_v40   ;;  %v1873_v39 = vunpack.c.h.bf16 %v2113_v18 }
  0x52   :  { %731 = vperm.xlu1 %2211, %v465_v41   ;;  %726 = vperm.xlu0 %2210, %v464_v42  }
  0x56   :  { %741 = vperm.xlu1 %2211, %v467_v43   ;;  %736 = vperm.xlu0 %2210, %v466_v44  }
  0x5a   :  { %751 = vperm.xlu1 %2211, %v469_v45   ;;  %746 = vperm.xlu0 %2210, %v468_v46   ;;  %v1676_v45 = vunpack.c.l.bf16 %v2064_v35  ;;  %v1876_v46 = vunpack.c.l.bf16 %v2114_v36 }
  0x5e   :  { %761 = vperm.xlu1 %2211, %v471_v47   ;;  %756 = vperm.xlu0 %2210, %v470_v48   ;;  %v495_v47 = vld [vmem:[%s2921_s1 + $0x238] sm:$0xff] }
  0x62   :  { %771 = vperm.xlu1 %2211, %v473_v49   ;;  %766 = vperm.xlu0 %2210, %v472_v50  }
  0x66   :  { %781 = vperm.xlu1 %2211, %v475_v51   ;;  %776 = vperm.xlu0 %2210, %v474_v52   ;;  %v494_v52 = vld [vmem:[%s2921_s1 + $0x230] sm:$0xff] }
  0x6a   :  { %791 = vperm.xlu1 %2211, %v477_v53   ;;  %786 = vperm.xlu0 %2210, %v476_v54   ;;  %v2065_v53 = vld [vmem:[%s2922_s0 + $0x20] sm:$0xff]   ;;  %v2115_v54 = vld [vmem:[%s2922_s0 + $0x1b0] sm:$0xff]  }
  0x6e   :  { %801 = vperm.xlu1 %2211, %v479_v55   ;;  %796 = vperm.xlu0 %2210, %v478_v56   ;;  %v1677_v56 = vunpack.c.h.bf16 %v2064_v35 }
  0x72   :  { %811 = vperm.xlu1 %2211, %v481_v57   ;;  %806 = vperm.xlu0 %2210, %v480_v58   ;;  %v1877_v57 = vunpack.c.h.bf16 %v2114_v36 }
  0x76   :  { %821 = vperm.xlu1 %2211, %v483_v59   ;;  %816 = vperm.xlu0 %2210, %v482_v60  }
  0x7a   :  { %831 = vperm.xlu1 %2211, %v485_v61   ;;  %826 = vperm.xlu0 %2210, %v484_v62  }
  0x7e   :  { %841 = vperm.xlu1 %2211, %v487_v63   ;;  %836 = vperm.xlu0 %2210, %v486_v0   ;;  %v1680_v63 = vunpack.c.l.bf16 %v2065_v53  ;;  %v1880_v0 = vunpack.c.l.bf16 %v2115_v54 }
  0x81   :  { %v537_v5 = vpop.permute.xlu1 %536  ;;  %v527_v8 = vpop.permute.xlu0 %526 }
  0x82   :  { %851 = vperm.xlu1 %2211, %v489_v3   ;;  %846 = vperm.xlu0 %2210, %v488_v4   ;;  %v1024_v23 = vmul.f32 %v1664_v9, %v527_v8  ;;  %v1124_v24 = vmul.f32 %v1864_v10, %v527_v8  ;;  %v1026_v30 = vmul.f32 %v1668_v14, %v537_v5  ;;  %v2116_v8 = vld [vmem:[%s2922_s0 + $0x1b8] sm:$0xff]   ;;  %v1681_v10 = vunpack.c.h.bf16 %v2065_v53 }
  0x83   :  { %v1126_v31 = vmul.f32 %v1868_v15, %v537_v5  ;;  %v1884_v18 = vunpack.c.l.bf16 %v2116_v8 }
  0x85   :  { %v542_v19 = vpop.permute.xlu1 %541  ;;  %v532_v22 = vpop.permute.xlu0 %531 }
  0x86   :  { %v1025_v25 = vmul.f32 %v1665_v11, %v532_v22  ;;  %v1125_v26 = vmul.f32 %v1865_v12, %v532_v22  ;;  %861 = vperm.xlu1 %2211, %v491_v13   ;;  %856 = vperm.xlu0 %2210, %v490_v16   ;;  %v1027_v41 = vmul.f32 %v1669_v20, %v542_v19  ;;  %v1881_v11 = vunpack.c.h.bf16 %v2115_v54 }
  0x87   :  { %v1127_v42 = vmul.f32 %v1869_v21, %v542_v19  ;;  %v499_v19 = vld [vmem:[%s2921_s1 + $0x258] sm:$0xff] }
  0x88   :  { %v1224_v32 = vadd.f32 %v1025_v25, %v1024_v23  ;;  %v1329_v33 = vadd.f32 %v1125_v26, %v1124_v24  ;;  %v498_v24 = vld [vmem:[%s2921_s1 + $0x250] sm:$0xff]  ;;  %v2117_v26 = vld [vmem:[%s2922_s0 + $0x1c0] sm:$0xff]  }
  0x89   :  { %v552_v37 = vpop.permute.xlu1 %551  ;;  %v547_v40 = vpop.permute.xlu0 %546  ;;  %v2067_v25 = vld [vmem:[%s2922_s0 + $0x30] sm:$0xff]   ;;  %v1888_v36 = vunpack.c.l.bf16 %v2117_v26 }
  0x8a   :  { %v1225_v43 = vadd.f32 %v1224_v32, %v1026_v30  ;;  %v1330_v44 = vadd.f32 %v1329_v33, %v1126_v31  ;;  %871 = vperm.xlu1 %2211, %v493_v29   ;;  %866 = vperm.xlu0 %2210, %v492_v34   ;;  %v1028_v50 = vmul.f32 %v1672_v27, %v547_v40  ;;  %v1885_v29 = vunpack.c.h.bf16 %v2116_v8 }
  0x8b   :  { %v1128_v51 = vmul.f32 %v1872_v28, %v547_v40  ;;  %v1029_v59 = vmul.f32 %v1673_v38, %v552_v37  ;;  %v1129_v60 = vmul.f32 %v1873_v39, %v552_v37  ;;  %v1685_v28 = vunpack.c.h.bf16 %v2066_v7  ;;  %v501_v37 = vld [vmem:[%s2921_s1 + $0x268] sm:$0xff] }
  0x8c   :  { %v1226_v48 = vadd.f32 %v1225_v43, %v1027_v41  ;;  %v1331_v49 = vadd.f32 %v1330_v44, %v1127_v42  ;;  %v1688_v35 = vunpack.c.l.bf16 %v2067_v25  ;;  %v500_v42 = vld [vmem:[%s2921_s1 + $0x260] sm:$0xff]  ;;  %v2068_v43 = vld [vmem:[%s2922_s0 + $0x38] sm:$0xff]   ;;  %v2118_v44 = vld [vmem:[%s2922_s0 + $0x1c8] sm:$0xff]  }
  0x8d   :  { %v562_v55 = vpop.permute.xlu1 %561  ;;  %v557_v58 = vpop.permute.xlu0 %556  ;;  %v1692_v53 = vunpack.c.l.bf16 %v2068_v43  ;;  %v1892_v54 = vunpack.c.l.bf16 %v2118_v44 }
  0x8e   :  { %v1227_v61 = vadd.f32 %v1226_v48, %v1028_v50  ;;  %v1332_v62 = vadd.f32 %v1331_v49, %v1128_v51  ;;  %881 = vperm.xlu1 %2211, %v495_v47   ;;  %876 = vperm.xlu0 %2210, %v494_v52   ;;  %v1030_v4 = vmul.f32 %v1676_v45, %v557_v58  ;;  %v1889_v47 = vunpack.c.h.bf16 %v2117_v26 }
  0x8f   :  { %v1130_v5 = vmul.f32 %v1876_v46, %v557_v58  ;;  %v1031_v13 = vmul.f32 %v1677_v56, %v562_v55  ;;  %v1131_v14 = vmul.f32 %v1877_v57, %v562_v55  ;;  %v1689_v46 = vunpack.c.h.bf16 %v2067_v25  ;;  %v503_v55 = vld [vmem:[%s2921_s1 + $0x278] sm:$0xff] }
  0x90   :  { %v1228_v2 = vadd.f32 %v1227_v61, %v1029_v59  ;;  %v1333_v3 = vadd.f32 %v1332_v62, %v1129_v60  ;;  %v502_v60 = vld [vmem:[%s2921_s1 + $0x270] sm:$0xff]  ;;  %v2069_v61 = vld [vmem:[%s2922_s0 + $0x40] sm:$0xff]  }
  0x91   :  { %v572_v9 = vpop.permute.xlu1 %571  ;;  %v567_v12 = vpop.permute.xlu0 %566  ;;  %v2119_v62 = vld [vmem:[%s2922_s0 + $0x1d0] sm:$0xff]   ;;  %v1696_v7 = vunpack.c.l.bf16 %v2069_v61 }
  0x92   :  { %v1229_v15 = vadd.f32 %v1228_v2, %v1030_v4  ;;  %v1334_v16 = vadd.f32 %v1333_v3, %v1130_v5  ;;  %891 = vperm.xlu1 %2211, %v497_v1   ;;  %886 = vperm.xlu0 %2210, %v496_v6   ;;  %v1032_v22 = vmul.f32 %v1680_v63, %v567_v12  ;;  %v1893_v1 = vunpack.c.h.bf16 %v2118_v44 }
  0x93   :  { %v1132_v23 = vmul.f32 %v1880_v0, %v567_v12  ;;  %v1033_v31 = vmul.f32 %v1681_v10, %v572_v9  ;;  %v1133_v32 = vmul.f32 %v1881_v11, %v572_v9  ;;  %v1693_v0 = vunpack.c.h.bf16 %v2068_v43  ;;  %v505_v9 = vld [vmem:[%s2921_s1 + $0x288] sm:$0xff] }
  0x94   :  { %v1230_v20 = vadd.f32 %v1229_v15, %v1031_v13  ;;  %v1335_v21 = vadd.f32 %v1334_v16, %v1131_v14  ;;  %v1896_v8 = vunpack.c.l.bf16 %v2119_v62  ;;  %v504_v14 = vld [vmem:[%s2921_s1 + $0x280] sm:$0xff]  ;;  %v2070_v15 = vld [vmem:[%s2922_s0 + $0x48] sm:$0xff]   ;;  %v2120_v16 = vld [vmem:[%s2922_s0 + $0x1d8] sm:$0xff]  }
  0x95   :  { %v582_v27 = vpop.permute.xlu1 %581  ;;  %v577_v30 = vpop.permute.xlu0 %576  ;;  %v1700_v25 = vunpack.c.l.bf16 %v2070_v15  ;;  %v1900_v26 = vunpack.c.l.bf16 %v2120_v16 }
  0x96   :  { %v1231_v33 = vadd.f32 %v1230_v20, %v1032_v22  ;;  %v1336_v34 = vadd.f32 %v1335_v21, %v1132_v23  ;;  %901 = vperm.xlu1 %2211, %v499_v19   ;;  %896 = vperm.xlu0 %2210, %v498_v24   ;;  %v1034_v40 = vmul.f32 %v1684_v17, %v577_v30  ;;  %v1897_v19 = vunpack.c.h.bf16 %v2119_v62 }
  0x97   :  { %v1134_v41 = vmul.f32 %v1884_v18, %v577_v30  ;;  %v1035_v49 = vmul.f32 %v1685_v28, %v582_v27  ;;  %v1135_v50 = vmul.f32 %v1885_v29, %v582_v27  ;;  %v1697_v18 = vunpack.c.h.bf16 %v2069_v61  ;;  %v507_v27 = vld [vmem:[%s2921_s1 + $0x298] sm:$0xff] }
  0x98   :  { %v1232_v38 = vadd.f32 %v1231_v33, %v1033_v31  ;;  %v1337_v39 = vadd.f32 %v1336_v34, %v1133_v32  ;;  %v506_v32 = vld [vmem:[%s2921_s1 + $0x290] sm:$0xff]  ;;  %v2121_v34 = vld [vmem:[%s2922_s0 + $0x1e0] sm:$0xff]  }
  0x99   :  { %v592_v45 = vpop.permute.xlu1 %591  ;;  %v587_v48 = vpop.permute.xlu0 %586  ;;  %v2071_v33 = vld [vmem:[%s2922_s0 + $0x50] sm:$0xff]   ;;  %v1904_v44 = vunpack.c.l.bf16 %v2121_v34 }
  0x9a   :  { %v1233_v51 = vadd.f32 %v1232_v38, %v1034_v40  ;;  %v1338_v52 = vadd.f32 %v1337_v39, %v1134_v41  ;;  %911 = vperm.xlu1 %2211, %v501_v37   ;;  %906 = vperm.xlu0 %2210, %v500_v42   ;;  %v1036_v58 = vmul.f32 %v1688_v35, %v587_v48  ;;  %v1901_v37 = vunpack.c.h.bf16 %v2120_v16 }
  0x9b   :  { %v1136_v59 = vmul.f32 %v1888_v36, %v587_v48  ;;  %v1037_v3 = vmul.f32 %v1689_v46, %v592_v45  ;;  %v1137_v4 = vmul.f32 %v1889_v47, %v592_v45  ;;  %v1701_v36 = vunpack.c.h.bf16 %v2070_v15  ;;  %v509_v45 = vld [vmem:[%s2921_s1 + $0x2a8] sm:$0xff] }
  0x9c   :  { %v1234_v56 = vadd.f32 %v1233_v51, %v1035_v49  ;;  %v1339_v57 = vadd.f32 %v1338_v52, %v1135_v50  ;;  %v1704_v43 = vunpack.c.l.bf16 %v2071_v33  ;;  %v508_v50 = vld [vmem:[%s2921_s1 + $0x2a0] sm:$0xff]  ;;  %v2072_v51 = vld [vmem:[%s2922_s0 + $0x58] sm:$0xff]   ;;  %v2122_v52 = vld [vmem:[%s2922_s0 + $0x1e8] sm:$0xff]  }
  0x9d   :  { %v602_v63 = vpop.permute.xlu1 %601  ;;  %v597_v2 = vpop.permute.xlu0 %596  ;;  %v1708_v61 = vunpack.c.l.bf16 %v2072_v51  ;;  %v1908_v62 = vunpack.c.l.bf16 %v2122_v52 }
  0x9e   :  { %v1235_v5 = vadd.f32 %v1234_v56, %v1036_v58  ;;  %v1340_v6 = vadd.f32 %v1339_v57, %v1136_v59  ;;  %921 = vperm.xlu1 %2211, %v503_v55   ;;  %916 = vperm.xlu0 %2210, %v502_v60   ;;  %v1038_v12 = vmul.f32 %v1692_v53, %v597_v2  ;;  %v1905_v55 = vunpack.c.h.bf16 %v2121_v34 }
  0x9f   :  { %v1138_v13 = vmul.f32 %v1892_v54, %v597_v2  ;;  %v1039_v21 = vmul.f32 %v1693_v0, %v602_v63  ;;  %v1139_v22 = vmul.f32 %v1893_v1, %v602_v63  ;;  %v1705_v54 = vunpack.c.h.bf16 %v2071_v33  ;;  %v511_v63 = vld [vmem:[%s2921_s1 + $0x2b8] sm:$0xff] }
  0xa0   :  { %v1236_v10 = vadd.f32 %v1235_v5, %v1037_v3  ;;  %v1341_v11 = vadd.f32 %v1340_v6, %v1137_v4  ;;  %v510_v4 = vld [vmem:[%s2921_s1 + $0x2b0] sm:$0xff]  ;;  %v2073_v5 = vld [vmem:[%s2922_s0 + $0x60] sm:$0xff]  }
  0xa1   :  { %v612_v17 = vpop.permute.xlu1 %611  ;;  %v607_v20 = vpop.permute.xlu0 %606  ;;  %v2123_v6 = vld [vmem:[%s2922_s0 + $0x1f0] sm:$0xff]   ;;  %v1712_v15 = vunpack.c.l.bf16 %v2073_v5 }
  0xa2   :  { %v1237_v23 = vadd.f32 %v1236_v10, %v1038_v12  ;;  %v1342_v24 = vadd.f32 %v1341_v11, %v1138_v13  ;;  %931 = vperm.xlu1 %2211, %v505_v9   ;;  %926 = vperm.xlu0 %2210, %v504_v14   ;;  %v1040_v30 = vmul.f32 %v1696_v7, %v607_v20  ;;  %v1909_v9 = vunpack.c.h.bf16 %v2122_v52 }
  0xa3   :  { %v1140_v31 = vmul.f32 %v1896_v8, %v607_v20  ;;  %v1041_v39 = vmul.f32 %v1697_v18, %v612_v17  ;;  %v1141_v40 = vmul.f32 %v1897_v19, %v612_v17  ;;  %v1709_v8 = vunpack.c.h.bf16 %v2072_v51  ;;  %v513_v17 = vld [vmem:[%s2921_s1 + $0x2c8] sm:$0xff] }
  0xa4   :  { %v1238_v28 = vadd.f32 %v1237_v23, %v1039_v21  ;;  %v1343_v29 = vadd.f32 %v1342_v24, %v1139_v22  ;;  %v1912_v16 = vunpack.c.l.bf16 %v2123_v6  ;;  %v512_v22 = vld [vmem:[%s2921_s1 + $0x2c0] sm:$0xff]  ;;  %v2074_v23 = vld [vmem:[%s2922_s0 + $0x68] sm:$0xff]   ;;  %v2124_v24 = vld [vmem:[%s2922_s0 + $0x1f8] sm:$0xff]  }
  0xa5   :  { %v622_v35 = vpop.permute.xlu1 %621  ;;  %v617_v38 = vpop.permute.xlu0 %616  ;;  %v1716_v33 = vunpack.c.l.bf16 %v2074_v23  ;;  %v1916_v34 = vunpack.c.l.bf16 %v2124_v24 }
  0xa6   :  { %v1239_v41 = vadd.f32 %v1238_v28, %v1040_v30  ;;  %v1344_v42 = vadd.f32 %v1343_v29, %v1140_v31  ;;  %941 = vperm.xlu1 %2211, %v507_v27   ;;  %936 = vperm.xlu0 %2210, %v506_v32   ;;  %v1042_v48 = vmul.f32 %v1700_v25, %v617_v38  ;;  %v1913_v27 = vunpack.c.h.bf16 %v2123_v6 }
  0xa7   :  { %v1142_v49 = vmul.f32 %v1900_v26, %v617_v38  ;;  %v1043_v57 = vmul.f32 %v1701_v36, %v622_v35  ;;  %v1143_v58 = vmul.f32 %v1901_v37, %v622_v35  ;;  %v1713_v26 = vunpack.c.h.bf16 %v2073_v5  ;;  %v515_v35 = vld [vmem:[%s2921_s1 + $0x2d8] sm:$0xff] }
  0xa8   :  { %v1240_v46 = vadd.f32 %v1239_v41, %v1041_v39  ;;  %v1345_v47 = vadd.f32 %v1344_v42, %v1141_v40  ;;  %v514_v40 = vld [vmem:[%s2921_s1 + $0x2d0] sm:$0xff]  ;;  %v2125_v42 = vld [vmem:[%s2922_s0 + $0x200] sm:$0xff]  }
  0xa9   :  { %v632_v53 = vpop.permute.xlu1 %631  ;;  %v627_v56 = vpop.permute.xlu0 %626  ;;  %v2075_v41 = vld [vmem:[%s2922_s0 + $0x70] sm:$0xff]   ;;  %v1920_v52 = vunpack.c.l.bf16 %v2125_v42 }
  0xaa   :  { %v1241_v59 = vadd.f32 %v1240_v46, %v1042_v48  ;;  %v1346_v60 = vadd.f32 %v1345_v47, %v1142_v49  ;;  %951 = vperm.xlu1 %2211, %v509_v45   ;;  %946 = vperm.xlu0 %2210, %v508_v50   ;;  %v1044_v2 = vmul.f32 %v1704_v43, %v627_v56  ;;  %v1917_v45 = vunpack.c.h.bf16 %v2124_v24 }
  0xab   :  { %v1144_v3 = vmul.f32 %v1904_v44, %v627_v56  ;;  %v1045_v11 = vmul.f32 %v1705_v54, %v632_v53  ;;  %v1145_v12 = vmul.f32 %v1905_v55, %v632_v53  ;;  %v1717_v44 = vunpack.c.h.bf16 %v2074_v23  ;;  %v517_v53 = vld [vmem:[%s2921_s1 + $0x2e8] sm:$0xff] }
  0xac   :  { %v1242_v0 = vadd.f32 %v1241_v59, %v1043_v57  ;;  %v1347_v1 = vadd.f32 %v1346_v60, %v1143_v58  ;;  %v1720_v51 = vunpack.c.l.bf16 %v2075_v41  ;;  %v516_v58 = vld [vmem:[%s2921_s1 + $0x2e0] sm:$0xff]  ;;  %v2076_v59 = vld [vmem:[%s2922_s0 + $0x78] sm:$0xff]   ;;  %v2126_v60 = vld [vmem:[%s2922_s0 + $0x208] sm:$0xff]  }
  0xad   :  { %v642_v7 = vpop.permute.xlu1 %641  ;;  %v637_v10 = vpop.permute.xlu0 %636  ;;  %v1724_v5 = vunpack.c.l.bf16 %v2076_v59  ;;  %v1924_v6 = vunpack.c.l.bf16 %v2126_v60 }
  0xae   :  { %v1243_v13 = vadd.f32 %v1242_v0, %v1044_v2  ;;  %v1348_v14 = vadd.f32 %v1347_v1, %v1144_v3  ;;  %961 = vperm.xlu1 %2211, %v511_v63   ;;  %956 = vperm.xlu0 %2210, %v510_v4   ;;  %v1046_v20 = vmul.f32 %v1708_v61, %v637_v10  ;;  %v1921_v63 = vunpack.c.h.bf16 %v2125_v42 }
  0xaf   :  { %v1146_v21 = vmul.f32 %v1908_v62, %v637_v10  ;;  %v1047_v29 = vmul.f32 %v1709_v8, %v642_v7  ;;  %v1147_v30 = vmul.f32 %v1909_v9, %v642_v7  ;;  %v1721_v62 = vunpack.c.h.bf16 %v2075_v41  ;;  %v519_v7 = vld [vmem:[%s2921_s1 + $0x2f8] sm:$0xff] }
  0xb0   :  { %v1244_v18 = vadd.f32 %v1243_v13, %v1045_v11  ;;  %v1349_v19 = vadd.f32 %v1348_v14, %v1145_v12  ;;  %v518_v12 = vld [vmem:[%s2921_s1 + $0x2f0] sm:$0xff]  ;;  %v2077_v13 = vld [vmem:[%s2922_s0 + $0x80] sm:$0xff]  }
  0xb1   :  { %v652_v25 = vpop.permute.xlu1 %651  ;;  %v647_v28 = vpop.permute.xlu0 %646  ;;  %v2127_v14 = vld [vmem:[%s2922_s0 + $0x210] sm:$0xff]   ;;  %v1728_v23 = vunpack.c.l.bf16 %v2077_v13 }
  0xb2   :  { %v1245_v31 = vadd.f32 %v1244_v18, %v1046_v20  ;;  %v1350_v32 = vadd.f32 %v1349_v19, %v1146_v21  ;;  %971 = vperm.xlu1 %2211, %v513_v17   ;;  %966 = vperm.xlu0 %2210, %v512_v22   ;;  %v1048_v38 = vmul.f32 %v1712_v15, %v647_v28  ;;  %v1925_v17 = vunpack.c.h.bf16 %v2126_v60 }
  0xb3   :  { %v1148_v39 = vmul.f32 %v1912_v16, %v647_v28  ;;  %v1049_v47 = vmul.f32 %v1713_v26, %v652_v25  ;;  %v1149_v48 = vmul.f32 %v1913_v27, %v652_v25  ;;  %v1725_v16 = vunpack.c.h.bf16 %v2076_v59  ;;  %v521_v25 = vld [vmem:[%s2921_s1 + $0x308] sm:$0xff] }
  0xb4   :  { %v1246_v36 = vadd.f32 %v1245_v31, %v1047_v29  ;;  %v1351_v37 = vadd.f32 %v1350_v32, %v1147_v30  ;;  %v1928_v24 = vunpack.c.l.bf16 %v2127_v14  ;;  %v520_v30 = vld [vmem:[%s2921_s1 + $0x300] sm:$0xff]  ;;  %v2078_v31 = vld [vmem:[%s2922_s0 + $0x88] sm:$0xff]   ;;  %v2128_v32 = vld [vmem:[%s2922_s0 + $0x218] sm:$0xff]  }
  0xb5   :  { %v662_v43 = vpop.permute.xlu1 %661  ;;  %v657_v46 = vpop.permute.xlu0 %656 }
  0xb6   :  { %v1247_v49 = vadd.f32 %v1246_v36, %v1048_v38  ;;  %v1352_v50 = vadd.f32 %v1351_v37, %v1148_v39  ;;  %981 = vperm.xlu1 %2211, %v515_v35   ;;  %976 = vperm.xlu0 %2210, %v514_v40   ;;  %v1050_v56 = vmul.f32 %v1716_v33, %v657_v46  ;;  %v1929_v35 = vunpack.c.h.bf16 %v2127_v14  ;;  %v523_v37 = vld [vmem:[%s2921_s1 + $0x318] sm:$0xff]  ;;  %v2212_v38 = vld [vmem:[%s2923_s2] sm:$0xff]  }
  0xb7   :  { %v1150_v57 = vmul.f32 %v1916_v34, %v657_v46  ;;  %v1051_v1 = vmul.f32 %v1717_v44, %v662_v43  ;;  %v1151_v2 = vmul.f32 %v1917_v45, %v662_v43  ;;  %v1729_v34 = vunpack.c.h.bf16 %v2077_v13  ;;  %v522_v43 = vld [vmem:[%s2921_s1 + $0x310] sm:$0xff] }
  0xb8   :  { %v1248_v54 = vadd.f32 %v1247_v49, %v1049_v47  ;;  %v1353_v55 = vadd.f32 %v1352_v50, %v1149_v48  ;;  %v1732_v45 = vunpack.c.l.bf16 %v2078_v31  ;;  %v2225_v46 = vmov 0.0  }
  0xb9   :  { %v672_v61 = vpop.permute.xlu1 %671  ;;  %v667_v0 = vpop.permute.xlu0 %666  ;;  %2175 = vmatprep.subr.bf16.mxu0 %v2225_v46  ;;  %v1932_v50 = vunpack.c.l.bf16 %v2128_v32  ;;  %2195 = vmatprep.subr.bf16.mxu1 %v2225_v46 }
  0xba   :  { %v1249_v3 = vadd.f32 %v1248_v54, %v1050_v56  ;;  %v1354_v4 = vadd.f32 %v1353_v55, %v1150_v57  ;;  %991 = vperm.xlu1 %2211, %v517_v53   ;;  %986 = vperm.xlu0 %2210, %v516_v58   ;;  %v1052_v10 = vmul.f32 %v1720_v51, %v667_v0  ;;  %v2079_v51 = vld [vmem:[%s2922_s0 + $0x90] sm:$0xff]   ;;  %v1733_v54 = vunpack.c.h.bf16 %v2078_v31  ;;  %v2213_v57 = vld [vmem:[%s2923_s2 + $0x8] sm:$0xff]  }
  0xbb   :  { %v1152_v11 = vmul.f32 %v1920_v52, %v667_v0  ;;  %v1053_v19 = vmul.f32 %v1721_v62, %v672_v61  ;;  %v1153_v20 = vmul.f32 %v1921_v63, %v672_v61  ;;  %v2129_v52 = vld [vmem:[%s2922_s0 + $0x220] sm:$0xff]   ;;  %2176 = vmatpush3.bf16.msra.mxu0 %v2212_v38  ;;  %v1933_v55 = vunpack.c.h.bf16 %v2128_v32  ;;  %v2082_v38 = vld [vmem:[%s2922_s0 + $0xa8] sm:$0xff]   ;;  %2191 = vmatprep.mubr.msk.bf16.mxu0 %vm2226_vm0, %v2225_v46 }
  0xbc   :  { %v1250_v8 = vadd.f32 %v1249_v3, %v1051_v1  ;;  %v1355_v9 = vadd.f32 %v1354_v4, %v1151_v2  ;;  %2177 = vmatprep.subr.bf16.mxu0 %v2225_v46  ;;  %v1736_v62 = vunpack.c.l.bf16 %v2079_v51  ;;  %v1936_v63 = vunpack.c.l.bf16 %v2129_v52  ;;  %v2080_v4 = vld [vmem:[%s2922_s0 + $0x98] sm:$0xff]   ;;  %2203 = vmatprep.mubr.msk.bf16.mxu1 %vm2226_vm0, %v2225_v46 }
  0xbd   :  { %v682_v15 = vpop.permute.xlu1 %681  ;;  %v677_v18 = vpop.permute.xlu0 %676 }
  0xbe   :  { %v1251_v21 = vadd.f32 %v1250_v8, %v1052_v10  ;;  %v1356_v22 = vadd.f32 %v1355_v9, %v1152_v11  ;;  %1001 = vperm.xlu1 %2211, %v519_v7   ;;  %996 = vperm.xlu0 %2210, %v518_v12   ;;  %v1054_v28 = vmul.f32 %v1724_v5, %v677_v18  ;;  %v2130_v5 = vld [vmem:[%s2922_s0 + $0x228] sm:$0xff]   ;;  %v1737_v7 = vunpack.c.h.bf16 %v2079_v51  ;;  %v2214_v10 = vld [vmem:[%s2923_s2 + $0x10] sm:$0xff]  }
  0xbf   :  { %v1154_v29 = vmul.f32 %v1924_v6, %v677_v18  ;;  %v1055_v39 = vmul.f32 %v1725_v16, %v682_v15  ;;  %v1155_v40 = vmul.f32 %v1925_v17, %v682_v15  ;;  %2178 = vmatpush3.bf16.msra.mxu0 %v2213_v57  ;;  %v1937_v8 = vunpack.c.h.bf16 %v2129_v52 }
  0xc0   :  { %v1252_v26 = vadd.f32 %v1251_v21, %v1053_v19  ;;  %v1357_v27 = vadd.f32 %v1356_v22, %v1153_v20  ;;  %2179 = vmatprep.subr.bf16.mxu0 %v2225_v46  ;;  %v1740_v15 = vunpack.c.l.bf16 %v2080_v4  ;;  %v1940_v16 = vunpack.c.l.bf16 %v2130_v5  ;;  %v2081_v21 = vld [vmem:[%s2922_s0 + $0xa0] sm:$0xff]   ;;  %v2131_v22 = vld [vmem:[%s2922_s0 + $0x230] sm:$0xff]  }
  0xc1   :  { %v692_v33 = vpop.permute.xlu1 %691  ;;  %v687_v36 = vpop.permute.xlu0 %686  ;;  %v1744_v32 = vunpack.c.l.bf16 %v2081_v21 }
  0xc2   :  { %v1253_v41 = vadd.f32 %v1252_v26, %v1054_v28  ;;  %v1358_v42 = vadd.f32 %v1357_v27, %v1154_v29  ;;  %1011 = vperm.xlu1 %2211, %v521_v25   ;;  %v1056_v44 = vmul.f32 %v1728_v23, %v687_v36  ;;  %1006 = vperm.xlu0 %2210, %v520_v30   ;;  %v1941_v25 = vunpack.c.h.bf16 %v2130_v5  ;;  %v2215_v27 = vld [vmem:[%s2923_s2 + $0x18] sm:$0xff]  }
  0xc3   :  { %v1156_v49 = vmul.f32 %v1928_v24, %v687_v36  ;;  %v1057_v58 = vmul.f32 %v1729_v34, %v692_v33  ;;  %v1157_v59 = vmul.f32 %v1929_v35, %v692_v33  ;;  %2180 = vmatpush3.bf16.msra.mxu0 %v2214_v10  ;;  %v1741_v24 = vunpack.c.h.bf16 %v2080_v4  ;;  %v2134_v10 = vld [vmem:[%s2922_s0 + $0x248] sm:$0xff]  }
  0xc4   :  { %v1254_v47 = vadd.f32 %v1253_v41, %v1055_v39  ;;  %v1359_v48 = vadd.f32 %v1358_v42, %v1155_v40  ;;  %2181 = vmatprep.subr.bf16.mxu0 %v2225_v46  ;;  %v1944_v33 = vunpack.c.l.bf16 %v2131_v22  ;;  %v2132_v39 = vld [vmem:[%s2922_s0 + $0x238] sm:$0xff]   ;;  %v1745_v41 = vunpack.c.h.bf16 %v2081_v21 }
  0xc5   :  { %v702_v53 = vpop.permute.xlu1 %701  ;;  %v697_v56 = vpop.permute.xlu0 %696  ;;  %v1945_v42 = vunpack.c.h.bf16 %v2131_v22  ;;  %v1948_v51 = vunpack.c.l.bf16 %v2132_v39  ;;  %v1956_v21 = vunpack.c.l.bf16 %v2134_v10 }
  0xc6   :  { %v1255_v60 = vadd.f32 %v1254_v47, %v1056_v44  ;;  %v1360_v61 = vadd.f32 %v1359_v48, %v1156_v49  ;;  %1021 = vperm.xlu1 %2211, %v523_v37   ;;  %1016 = vperm.xlu0 %2210, %v522_v43   ;;  %v1058_v2 = vmul.f32 %v1732_v45, %v697_v56  ;;  %v2216_v44 = vld [vmem:[%s2923_s2 + $0x20] sm:$0xff]  }
  0xc7   :  { %v1158_v3 = vmul.f32 %v1932_v50, %v697_v56  ;;  %v1059_v11 = vmul.f32 %v1733_v54, %v702_v53  ;;  %v1159_v12 = vmul.f32 %v1933_v55, %v702_v53  ;;  %2182 = vmatpush3.bf16.msra.mxu0 %v2215_v27  ;;  %v1748_v50 = vunpack.c.l.bf16 %v2082_v38  ;;  %v2083_v56 = vld [vmem:[%s2922_s0 + $0xb0] sm:$0xff]  }
  0xc8   :  { %v1256_v0 = vadd.f32 %v1255_v60, %v1057_v58  ;;  %v1361_v1 = vadd.f32 %v1360_v61, %v1157_v59  ;;  %2183 = vmatprep.subr.bf16.mxu0 %v2225_v46  ;;  %v1749_v58 = vunpack.c.h.bf16 %v2082_v38  ;;  %v1949_v59 = vunpack.c.h.bf16 %v2132_v39  ;;  %v2133_v61 = vld [vmem:[%s2922_s0 + $0x240] sm:$0xff]   ;;  %v2135_v27 = vld [vmem:[%s2922_s0 + $0x250] sm:$0xff]  }
  0xc9   :  { %v712_v6 = vpop.permute.xlu1 %711  ;;  %v707_v9 = vpop.permute.xlu0 %706  ;;  %v1752_v4 = vunpack.c.l.bf16 %v2083_v56  ;;  %v1960_v38 = vunpack.c.l.bf16 %v2135_v27 }
  0xca   :  { %v1257_v13 = vadd.f32 %v1256_v0, %v1058_v2  ;;  %v1362_v14 = vadd.f32 %v1361_v1, %v1158_v3  ;;  %v1060_v19 = vmul.f32 %v1736_v62, %v707_v9  ;;  %v1160_v20 = vmul.f32 %v1936_v63, %v707_v9  ;;  %v2217_v62 = vld [vmem:[%s2923_s2 + $0x28] sm:$0xff]   ;;  %v2084_v9 = vld [vmem:[%s2922_s0 + $0xb8] sm:$0xff]  }
  0xcb   :  { %v1061_v28 = vmul.f32 %v1737_v7, %v712_v6  ;;  %v1161_v29 = vmul.f32 %v1937_v8, %v712_v6  ;;  %2184 = vmatpush3.bf16.msra.mxu0 %v2216_v44  ;;  %v1952_v8 = vunpack.c.l.bf16 %v2133_v61  ;;  %v2136_v44 = vld [vmem:[%s2922_s0 + $0x258] sm:$0xff]  }
  0xcc   :  { %v1258_v17 = vadd.f32 %v1257_v13, %v1059_v11  ;;  %v1363_v18 = vadd.f32 %v1362_v14, %v1159_v12  ;;  %2185 = vmatprep.subr.bf16.mxu0 %v2225_v46  ;;  %v2218_v11 = vld [vmem:[%s2923_s2 + $0x30] sm:$0xff]   ;;  %v1753_v13 = vunpack.c.h.bf16 %v2083_v56  ;;  %v1953_v14 = vunpack.c.h.bf16 %v2133_v61 }
  0xcd   :  { %v722_v23 = vpop.permute.xlu1 %721  ;;  %v717_v26 = vpop.permute.xlu0 %716 }
  0xce   :  { %v1259_v30 = vadd.f32 %v1258_v17, %v1060_v19  ;;  %v1364_v31 = vadd.f32 %v1363_v18, %v1160_v20  ;;  %v1062_v36 = vmul.f32 %v1740_v15, %v717_v26  ;;  %v1162_v37 = vmul.f32 %v1940_v16, %v717_v26  ;;  %v2085_v26 = vld [vmem:[%s2922_s0 + $0xc0] sm:$0xff]  }
  0xcf   :  { %v1063_v45 = vmul.f32 %v1741_v24, %v722_v23  ;;  %v1163_v47 = vmul.f32 %v1941_v25, %v722_v23  ;;  %2186 = vmatpush3.bf16.msra.mxu0 %v2217_v62  ;;  %v1756_v20 = vunpack.c.l.bf16 %v2084_v9 }
  0xd0   :  { %v1260_v34 = vadd.f32 %v1259_v30, %v1061_v28  ;;  %v1365_v35 = vadd.f32 %v1364_v31, %v1161_v29  ;;  %2187 = vmatprep.subr.bf16.mxu0 %v2225_v46  ;;  %v2219_v28 = vld [vmem:[%s2923_s2 + $0x38] sm:$0xff]   ;;  %v1757_v30 = vunpack.c.h.bf16 %v2084_v9  ;;  %v1957_v31 = vunpack.c.h.bf16 %v2134_v10 }
  0xd1   :  { %v732_v40 = vpop.permute.xlu1 %731  ;;  %v727_v43 = vpop.permute.xlu0 %726 }
  0xd2   :  { %v1261_v48 = vadd.f32 %v1260_v34, %v1062_v36  ;;  %v1366_v49 = vadd.f32 %v1365_v35, %v1162_v37  ;;  %v1064_v54 = vmul.f32 %v1744_v32, %v727_v43  ;;  %v1164_v55 = vmul.f32 %v1944_v33, %v727_v43  ;;  %v2086_v43 = vld [vmem:[%s2922_s0 + $0xc8] sm:$0xff]  }
  0xd3   :  { %v1065_v63 = vmul.f32 %v1745_v41, %v732_v40  ;;  %v1165_v0 = vmul.f32 %v1945_v42, %v732_v40  ;;  %2188 = vmatpush3.bf16.msra.mxu0 %v2218_v11  ;;  %v1760_v37 = vunpack.c.l.bf16 %v2085_v26  ;;  %v1764_v56 = vunpack.c.l.bf16 %v2086_v43 }
  0xd4   :  { %v1262_v52 = vadd.f32 %v1261_v48, %v1063_v45  ;;  %v1367_v53 = vadd.f32 %v1366_v49, %v1163_v47  ;;  %2189 = vmatprep.subr.bf16.mxu0 %v2225_v46  ;;  %v1761_v47 = vunpack.c.h.bf16 %v2085_v26  ;;  %v1961_v48 = vunpack.c.h.bf16 %v2135_v27 }
  0xd5   :  { %v742_v57 = vpop.permute.xlu1 %741  ;;  %v737_v60 = vpop.permute.xlu0 %736 }
  0xd6   :  { %v1263_v1 = vadd.f32 %v1262_v52, %v1064_v54  ;;  %v1368_v2 = vadd.f32 %v1367_v53, %v1164_v55  ;;  %v1066_v3 = vmul.f32 %v1748_v50, %v737_v60  ;;  %v1166_v5 = vmul.f32 %v1948_v51, %v737_v60  ;;  %v2087_v54 = vld [vmem:[%s2922_s0 + $0xd0] sm:$0xff]   ;;  %v2220_v55 = vld [vmem:[%s2924_s4] sm:$0xff]  }
  0xd7   :  { %v1067_v16 = vmul.f32 %v1749_v58, %v742_v57  ;;  %v1167_v17 = vmul.f32 %v1949_v59, %v742_v57  ;;  %2190 = vmatpush3.bf16.msra.mxu0 %v2219_v28  ;;  %v1964_v57 = vunpack.c.l.bf16 %v2136_v44  ;;  %v2137_v58 = vld [vmem:[%s2922_s0 + $0x260] sm:$0xff]   ;;  %2196 = vmatpush3.bf16.msra.mxu1 %v2220_v55 }
  0xd8   :  { %v1264_v6 = vadd.f32 %v1263_v1, %v1065_v63  ;;  %v1369_v7 = vadd.f32 %v1368_v2, %v1165_v0  ;;  %v2221_v63 = vld [vmem:[%s2924_s4 + $0x8] sm:$0xff]   ;;  %v1765_v1 = vunpack.c.h.bf16 %v2086_v43  ;;  %v1965_v2 = vunpack.c.h.bf16 %v2136_v44  ;;  %2197 = vmatprep.subr.bf16.mxu1 %v2225_v46 }
  0xd9   :  { %v752_v12 = vpop.permute.xlu1 %751  ;;  %v747_v15 = vpop.permute.xlu0 %746  ;;  %v1968_v9 = vunpack.c.l.bf16 %v2137_v58 }
  0xda   :  { %v1265_v18 = vadd.f32 %v1264_v6, %v1066_v3  ;;  %v1370_v19 = vadd.f32 %v1369_v7, %v1166_v5  ;;  %v1068_v22 = vmul.f32 %v1752_v4, %v747_v15  ;;  %v1168_v23 = vmul.f32 %v1952_v8, %v747_v15  ;;  %v2138_v15 = vld [vmem:[%s2922_s0 + $0x268] sm:$0xff]  }
  0xdb   :  { %v1069_v33 = vmul.f32 %v1753_v13, %v752_v12  ;;  %v1169_v34 = vmul.f32 %v1953_v14, %v752_v12  ;;  %v1768_v8 = vunpack.c.l.bf16 %v2087_v54  ;;  %v2088_v14 = vld [vmem:[%s2922_s0 + $0xd8] sm:$0xff]   ;;  %2198 = vmatpush3.bf16.msra.mxu1 %v2221_v63  ;;  %v2091_v63 = vld [vmem:[%s2922_s0 + $0xf0] sm:$0xff]  }
  0xdc   :  { %v1266_v24 = vadd.f32 %v1265_v18, %v1067_v16  ;;  %v1371_v25 = vadd.f32 %v1370_v19, %v1167_v17  ;;  %v1769_v17 = vunpack.c.h.bf16 %v2087_v54  ;;  %v1969_v18 = vunpack.c.h.bf16 %v2137_v58  ;;  %2199 = vmatprep.subr.bf16.mxu1 %v2225_v46 }
  0xdd   :  { %v762_v29 = vpop.permute.xlu1 %761  ;;  %v757_v32 = vpop.permute.xlu0 %756 }
  0xde   :  { %v1267_v35 = vadd.f32 %v1266_v24, %v1068_v22  ;;  %v1372_v36 = vadd.f32 %v1371_v25, %v1168_v23  ;;  %v1070_v39 = vmul.f32 %v1756_v20, %v757_v32  ;;  %v1170_v40 = vmul.f32 %v1956_v21, %v757_v32 }
  0xdf   :  { %v1071_v50 = vmul.f32 %v1757_v30, %v762_v29  ;;  %v1171_v51 = vmul.f32 %v1957_v31, %v762_v29  ;;  %v1772_v24 = vunpack.c.l.bf16 %v2088_v14  ;;  %v1972_v25 = vunpack.c.l.bf16 %v2138_v15  ;;  %v2089_v30 = vld [vmem:[%s2922_s0 + $0xe0] sm:$0xff]   ;;  %v2139_v31 = vld [vmem:[%s2922_s0 + $0x270] sm:$0xff]  }
  0xe0   :  { %v1268_v41 = vadd.f32 %v1267_v35, %v1069_v33  ;;  %v1373_v42 = vadd.f32 %v1372_v36, %v1169_v34  ;;  %v1773_v33 = vunpack.c.h.bf16 %v2088_v14  ;;  %v1973_v34 = vunpack.c.h.bf16 %v2138_v15  ;;  %v2092_v15 = vld [vmem:[%s2922_s0 + $0xf8] sm:$0xff]  }
  0xe1   :  { %v772_v45 = vpop.permute.xlu1 %771  ;;  %v767_v49 = vpop.permute.xlu0 %766 }
  0xe2   :  { %v1269_v52 = vadd.f32 %v1268_v41, %v1070_v39  ;;  %v1374_v53 = vadd.f32 %v1373_v42, %v1170_v40  ;;  %v1072_v59 = vmul.f32 %v1760_v37, %v767_v49  ;;  %v1172_v60 = vmul.f32 %v1960_v38, %v767_v49 }
  0xe3   :  { %v1073_v4 = vmul.f32 %v1761_v47, %v772_v45  ;;  %v1173_v5 = vmul.f32 %v1961_v48, %v772_v45  ;;  %v1776_v40 = vunpack.c.l.bf16 %v2089_v30  ;;  %v1976_v41 = vunpack.c.l.bf16 %v2139_v31  ;;  %v2090_v47 = vld [vmem:[%s2922_s0 + $0xe8] sm:$0xff]   ;;  %v2140_v48 = vld [vmem:[%s2922_s0 + $0x278] sm:$0xff]  }
  0xe4   :  { %v1270_v61 = vadd.f32 %v1269_v52, %v1071_v50  ;;  %v1375_v62 = vadd.f32 %v1374_v53, %v1171_v51  ;;  %v1777_v50 = vunpack.c.h.bf16 %v2089_v30  ;;  %v1977_v51 = vunpack.c.h.bf16 %v2139_v31  ;;  %v2093_v31 = vld [vmem:[%s2922_s0 + $0x100] sm:$0xff]  }
  0xe5   :  { %v782_v0 = vpop.permute.xlu1 %781  ;;  %v777_v3 = vpop.permute.xlu0 %776  ;;  %v1980_v58 = vunpack.c.l.bf16 %v2140_v48 }
  0xe6   :  { %v1271_v6 = vadd.f32 %v1270_v61, %v1072_v59  ;;  %v1376_v7 = vadd.f32 %v1375_v62, %v1172_v60  ;;  %v1074_v10 = vmul.f32 %v1764_v56, %v777_v3  ;;  %v1174_v11 = vmul.f32 %v1964_v57, %v777_v3 }
  0xe7   :  { %v1075_v20 = vmul.f32 %v1765_v1, %v782_v0  ;;  %v1175_v21 = vmul.f32 %v1965_v2, %v782_v0  ;;  %v1780_v57 = vunpack.c.l.bf16 %v2090_v47  ;;  %v2141_v0 = vld [vmem:[%s2922_s0 + $0x280] sm:$0xff]   ;;  %v1781_v2 = vunpack.c.h.bf16 %v2090_v47 }
  0xe8   :  { %v1272_v12 = vadd.f32 %v1271_v6, %v1073_v4  ;;  %v1377_v13 = vadd.f32 %v1376_v7, %v1173_v5  ;;  %v1981_v3 = vunpack.c.h.bf16 %v2140_v48  ;;  %v2094_v48 = vld [vmem:[%s2922_s0 + $0x108] sm:$0xff]  }
  0xe9   :  { %v792_v16 = vpop.permute.xlu1 %791  ;;  %v787_v19 = vpop.permute.xlu0 %786 }
  0xea   :  { %v1273_v22 = vadd.f32 %v1272_v12, %v1074_v10  ;;  %v1378_v23 = vadd.f32 %v1377_v13, %v1174_v11  ;;  %v1076_v26 = vmul.f32 %v1768_v8, %v787_v19  ;;  %v1176_v27 = vmul.f32 %v1968_v9, %v787_v19 }
  0xeb   :  { %v1077_v36 = vmul.f32 %v1769_v17, %v792_v16  ;;  %v1177_v37 = vmul.f32 %v1969_v18, %v792_v16  ;;  %v1784_v9 = vunpack.c.l.bf16 %v2091_v63  ;;  %v1984_v10 = vunpack.c.l.bf16 %v2141_v0  ;;  %v2142_v16 = vld [vmem:[%s2922_s0 + $0x288] sm:$0xff]  }
  0xec   :  { %v1274_v28 = vadd.f32 %v1273_v22, %v1075_v20  ;;  %v1379_v29 = vadd.f32 %v1378_v23, %v1175_v21  ;;  %v1785_v18 = vunpack.c.h.bf16 %v2091_v63  ;;  %v1985_v19 = vunpack.c.h.bf16 %v2141_v0  ;;  %v2095_v0 = vld [vmem:[%s2922_s0 + $0x110] sm:$0xff]  }
  0xed   :  { %v802_v32 = vpop.permute.xlu1 %801  ;;  %v797_v35 = vpop.permute.xlu0 %796 }
  0xee   :  { %v1275_v38 = vadd.f32 %v1274_v28, %v1076_v26  ;;  %v1380_v39 = vadd.f32 %v1379_v29, %v1176_v27  ;;  %v1078_v42 = vmul.f32 %v1772_v24, %v797_v35  ;;  %v1178_v43 = vmul.f32 %v1972_v25, %v797_v35 }
  0xef   :  { %v1079_v53 = vmul.f32 %v1773_v33, %v802_v32  ;;  %v1179_v54 = vmul.f32 %v1973_v34, %v802_v32  ;;  %v1788_v25 = vunpack.c.l.bf16 %v2092_v15  ;;  %v1988_v26 = vunpack.c.l.bf16 %v2142_v16  ;;  %v2143_v32 = vld [vmem:[%s2922_s0 + $0x290] sm:$0xff]  }
  0xf0   :  { %v1276_v44 = vadd.f32 %v1275_v38, %v1077_v36  ;;  %v1381_v45 = vadd.f32 %v1380_v39, %v1177_v37  ;;  %v1789_v34 = vunpack.c.h.bf16 %v2092_v15  ;;  %v1989_v35 = vunpack.c.h.bf16 %v2142_v16  ;;  %v2096_v16 = vld [vmem:[%s2922_s0 + $0x118] sm:$0xff]  }
  0xf1   :  { %v812_v49 = vpop.permute.xlu1 %811  ;;  %v807_v52 = vpop.permute.xlu0 %806 }
  0xf2   :  { %v1277_v55 = vadd.f32 %v1276_v44, %v1078_v42  ;;  %v1382_v56 = vadd.f32 %v1381_v45, %v1178_v43  ;;  %v1080_v59 = vmul.f32 %v1776_v40, %v807_v52  ;;  %v1180_v60 = vmul.f32 %v1976_v41, %v807_v52 }
  0xf3   :  { %v1081_v5 = vmul.f32 %v1777_v50, %v812_v49  ;;  %v1181_v6 = vmul.f32 %v1977_v51, %v812_v49  ;;  %v1792_v41 = vunpack.c.l.bf16 %v2093_v31  ;;  %v1992_v42 = vunpack.c.l.bf16 %v2143_v32  ;;  %v2144_v49 = vld [vmem:[%s2922_s0 + $0x298] sm:$0xff]  }
  0xf4   :  { %v1278_v61 = vadd.f32 %v1277_v55, %v1079_v53  ;;  %v1383_v62 = vadd.f32 %v1382_v56, %v1179_v54  ;;  %v1793_v51 = vunpack.c.h.bf16 %v2093_v31  ;;  %v1993_v52 = vunpack.c.h.bf16 %v2143_v32  ;;  %v2097_v32 = vld [vmem:[%s2922_s0 + $0x120] sm:$0xff]  }
  0xf5   :  { %v822_v1 = vpop.permute.xlu1 %821  ;;  %v817_v4 = vpop.permute.xlu0 %816 }
  0xf6   :  { %v1279_v7 = vadd.f32 %v1278_v61, %v1080_v59  ;;  %v1384_v8 = vadd.f32 %v1383_v62, %v1180_v60  ;;  %v1082_v11 = vmul.f32 %v1780_v57, %v817_v4  ;;  %v1182_v12 = vmul.f32 %v1980_v58, %v817_v4 }
  0xf7   :  { %v1083_v21 = vmul.f32 %v1781_v2, %v822_v1  ;;  %v1183_v22 = vmul.f32 %v1981_v3, %v822_v1  ;;  %v1796_v58 = vunpack.c.l.bf16 %v2094_v48  ;;  %v1996_v59 = vunpack.c.l.bf16 %v2144_v49  ;;  %v2145_v1 = vld [vmem:[%s2922_s0 + $0x2a0] sm:$0xff]  }
  0xf8   :  { %v1280_v13 = vadd.f32 %v1279_v7, %v1081_v5  ;;  %v1385_v14 = vadd.f32 %v1384_v8, %v1181_v6  ;;  %v1797_v3 = vunpack.c.h.bf16 %v2094_v48  ;;  %v1997_v4 = vunpack.c.h.bf16 %v2144_v49  ;;  %v2098_v49 = vld [vmem:[%s2922_s0 + $0x128] sm:$0xff]  }
  0xf9   :  { %v832_v17 = vpop.permute.xlu1 %831  ;;  %v827_v20 = vpop.permute.xlu0 %826 }
  0xfa   :  { %v1281_v23 = vadd.f32 %v1280_v13, %v1082_v11  ;;  %v1386_v24 = vadd.f32 %v1385_v14, %v1182_v12  ;;  %v1084_v27 = vmul.f32 %v1784_v9, %v827_v20  ;;  %v1184_v28 = vmul.f32 %v1984_v10, %v827_v20 }
  0xfb   :  { %v1085_v37 = vmul.f32 %v1785_v18, %v832_v17  ;;  %v1185_v38 = vmul.f32 %v1985_v19, %v832_v17  ;;  %v1800_v10 = vunpack.c.l.bf16 %v2095_v0  ;;  %v2000_v11 = vunpack.c.l.bf16 %v2145_v1  ;;  %v2146_v17 = vld [vmem:[%s2922_s0 + $0x2a8] sm:$0xff]  }
  0xfc   :  { %v1282_v29 = vadd.f32 %v1281_v23, %v1083_v21  ;;  %v1387_v30 = vadd.f32 %v1386_v24, %v1183_v22  ;;  %v1801_v19 = vunpack.c.h.bf16 %v2095_v0  ;;  %v2001_v20 = vunpack.c.h.bf16 %v2145_v1  ;;  %v2099_v1 = vld [vmem:[%s2922_s0 + $0x130] sm:$0xff]  }
  0xfd   :  { %v842_v33 = vpop.permute.xlu1 %841  ;;  %v837_v36 = vpop.permute.xlu0 %836 }
  0xfe   :  { %v1283_v39 = vadd.f32 %v1282_v29, %v1084_v27  ;;  %v1388_v40 = vadd.f32 %v1387_v30, %v1184_v28  ;;  %v1086_v43 = vmul.f32 %v1788_v25, %v837_v36  ;;  %v1186_v44 = vmul.f32 %v1988_v26, %v837_v36 }
  0xff   :  { %v1087_v53 = vmul.f32 %v1789_v34, %v842_v33  ;;  %v1187_v54 = vmul.f32 %v1989_v35, %v842_v33  ;;  %v1804_v26 = vunpack.c.l.bf16 %v2096_v16  ;;  %v2004_v27 = vunpack.c.l.bf16 %v2146_v17  ;;  %v2147_v33 = vld [vmem:[%s2922_s0 + $0x2b0] sm:$0xff]  }
 0x100   :  { %v1284_v45 = vadd.f32 %v1283_v39, %v1085_v37  ;;  %v1389_v47 = vadd.f32 %v1388_v40, %v1185_v38  ;;  %v1805_v35 = vunpack.c.h.bf16 %v2096_v16  ;;  %v2005_v36 = vunpack.c.h.bf16 %v2146_v17  ;;  %v2100_v17 = vld [vmem:[%s2922_s0 + $0x138] sm:$0xff]  }
 0x101   :  { %v852_v50 = vpop.permute.xlu1 %851  ;;  %v847_v57 = vpop.permute.xlu0 %846 }
 0x102   :  { %v1285_v55 = vadd.f32 %v1284_v45, %v1086_v43  ;;  %v1390_v56 = vadd.f32 %v1389_v47, %v1186_v44  ;;  %v1088_v60 = vmul.f32 %v1792_v41, %v847_v57  ;;  %v1188_v61 = vmul.f32 %v1992_v42, %v847_v57 }
 0x103   :  { %v1089_v5 = vmul.f32 %v1793_v51, %v852_v50  ;;  %v1189_v6 = vmul.f32 %v1993_v52, %v852_v50  ;;  %v1808_v42 = vunpack.c.l.bf16 %v2097_v32  ;;  %v2008_v43 = vunpack.c.l.bf16 %v2147_v33  ;;  %v2148_v50 = vld [vmem:[%s2922_s0 + $0x2b8] sm:$0xff]  }
 0x104   :  { %v1286_v62 = vadd.f32 %v1285_v55, %v1087_v53  ;;  %v1391_v63 = vadd.f32 %v1390_v56, %v1187_v54  ;;  %v1809_v52 = vunpack.c.h.bf16 %v2097_v32  ;;  %v2009_v53 = vunpack.c.h.bf16 %v2147_v33  ;;  %v2101_v33 = vld [vmem:[%s2922_s0 + $0x140] sm:$0xff]  }
 0x105   :  { %v862_v2 = vpop.permute.xlu1 %861  ;;  %v857_v9 = vpop.permute.xlu0 %856 }
 0x106   :  { %v1287_v7 = vadd.f32 %v1286_v62, %v1088_v60  ;;  %v1392_v8 = vadd.f32 %v1391_v63, %v1188_v61  ;;  %v1090_v12 = vmul.f32 %v1796_v58, %v857_v9  ;;  %v1190_v13 = vmul.f32 %v1996_v59, %v857_v9 }
 0x107   :  { %v1091_v21 = vmul.f32 %v1797_v3, %v862_v2  ;;  %v1191_v22 = vmul.f32 %v1997_v4, %v862_v2  ;;  %v1812_v59 = vunpack.c.l.bf16 %v2098_v49  ;;  %v2012_v60 = vunpack.c.l.bf16 %v2148_v50  ;;  %v2149_v2 = vld [vmem:[%s2922_s0 + $0x2c0] sm:$0xff]  }
 0x108   :  { %v1288_v14 = vadd.f32 %v1287_v7, %v1089_v5  ;;  %v1393_v15 = vadd.f32 %v1392_v8, %v1189_v6  ;;  %v1813_v4 = vunpack.c.h.bf16 %v2098_v49  ;;  %v2013_v5 = vunpack.c.h.bf16 %v2148_v50  ;;  %v2102_v50 = vld [vmem:[%s2922_s0 + $0x148] sm:$0xff]  }
 0x109   :  { %v872_v18 = vpop.permute.xlu1 %871  ;;  %v867_v25 = vpop.permute.xlu0 %866 }
 0x10a   :  { %v1289_v23 = vadd.f32 %v1288_v14, %v1090_v12  ;;  %v1394_v24 = vadd.f32 %v1393_v15, %v1190_v13  ;;  %v1092_v28 = vmul.f32 %v1800_v10, %v867_v25  ;;  %v1192_v29 = vmul.f32 %v2000_v11, %v867_v25 }
 0x10b   :  { %v1093_v37 = vmul.f32 %v1801_v19, %v872_v18  ;;  %v1193_v38 = vmul.f32 %v2001_v20, %v872_v18  ;;  %v1816_v11 = vunpack.c.l.bf16 %v2099_v1  ;;  %v2016_v12 = vunpack.c.l.bf16 %v2149_v2  ;;  %v2150_v18 = vld [vmem:[%s2922_s0 + $0x2c8] sm:$0xff]  }
 0x10c   :  { %v1290_v30 = vadd.f32 %v1289_v23, %v1091_v21  ;;  %v1395_v31 = vadd.f32 %v1394_v24, %v1191_v22  ;;  %v1817_v20 = vunpack.c.h.bf16 %v2099_v1  ;;  %v2017_v21 = vunpack.c.h.bf16 %v2149_v2  ;;  %v2103_v2 = vld [vmem:[%s2922_s0 + $0x150] sm:$0xff]  }
 0x10d   :  { %v882_v34 = vpop.permute.xlu1 %881  ;;  %v877_v41 = vpop.permute.xlu0 %876 }
 0x10e   :  { %v1291_v39 = vadd.f32 %v1290_v30, %v1092_v28  ;;  %v1396_v40 = vadd.f32 %v1395_v31, %v1192_v29  ;;  %v1094_v44 = vmul.f32 %v1804_v26, %v877_v41  ;;  %v1194_v45 = vmul.f32 %v2004_v27, %v877_v41 }
 0x10f   :  { %v1095_v54 = vmul.f32 %v1805_v35, %v882_v34  ;;  %v1195_v55 = vmul.f32 %v2005_v36, %v882_v34  ;;  %v1820_v27 = vunpack.c.l.bf16 %v2100_v17  ;;  %v2020_v28 = vunpack.c.l.bf16 %v2150_v18  ;;  %v2151_v34 = vld [vmem:[%s2922_s0 + $0x2d0] sm:$0xff]  }
 0x110   :  { %v1292_v47 = vadd.f32 %v1291_v39, %v1093_v37  ;;  %v1397_v48 = vadd.f32 %v1396_v40, %v1193_v38  ;;  %v1821_v36 = vunpack.c.h.bf16 %v2100_v17  ;;  %v2021_v37 = vunpack.c.h.bf16 %v2150_v18  ;;  %v2104_v18 = vld [vmem:[%s2922_s0 + $0x158] sm:$0xff]  }
 0x111   :  { %v892_v51 = vpop.permute.xlu1 %891  ;;  %v887_v58 = vpop.permute.xlu0 %886 }
 0x112   :  { %v1293_v56 = vadd.f32 %v1292_v47, %v1094_v44  ;;  %v1398_v57 = vadd.f32 %v1397_v48, %v1194_v45  ;;  %v1096_v61 = vmul.f32 %v1808_v42, %v887_v58  ;;  %v1196_v62 = vmul.f32 %v2008_v43, %v887_v58 }
 0x113   :  { %v1097_v6 = vmul.f32 %v1809_v52, %v892_v51  ;;  %v1197_v7 = vmul.f32 %v2009_v53, %v892_v51  ;;  %v1824_v43 = vunpack.c.l.bf16 %v2101_v33  ;;  %v2024_v44 = vunpack.c.l.bf16 %v2151_v34  ;;  %v2152_v51 = vld [vmem:[%s2922_s0 + $0x2d8] sm:$0xff]  }
 0x114   :  { %v1294_v63 = vadd.f32 %v1293_v56, %v1095_v54  ;;  %v1399_v0 = vadd.f32 %v1398_v57, %v1195_v55  ;;  %v1825_v53 = vunpack.c.h.bf16 %v2101_v33  ;;  %v2025_v54 = vunpack.c.h.bf16 %v2151_v34  ;;  %v2105_v34 = vld [vmem:[%s2922_s0 + $0x160] sm:$0xff]  }
 0x115   :  { %v902_v3 = vpop.permute.xlu1 %901  ;;  %v897_v10 = vpop.permute.xlu0 %896 }
 0x116   :  { %v1295_v8 = vadd.f32 %v1294_v63, %v1096_v61  ;;  %v1400_v9 = vadd.f32 %v1399_v0, %v1196_v62  ;;  %v1098_v13 = vmul.f32 %v1812_v59, %v897_v10  ;;  %v1198_v14 = vmul.f32 %v2012_v60, %v897_v10 }
 0x117   :  { %v1099_v22 = vmul.f32 %v1813_v4, %v902_v3  ;;  %v1199_v23 = vmul.f32 %v2013_v5, %v902_v3  ;;  %v1828_v60 = vunpack.c.l.bf16 %v2102_v50  ;;  %v2028_v61 = vunpack.c.l.bf16 %v2152_v51  ;;  %v2153_v3 = vld [vmem:[%s2922_s0 + $0x2e0] sm:$0xff]  }
 0x118   :  { %v1296_v15 = vadd.f32 %v1295_v8, %v1097_v6  ;;  %v1401_v16 = vadd.f32 %v1400_v9, %v1197_v7  ;;  %v1829_v5 = vunpack.c.h.bf16 %v2102_v50  ;;  %v2029_v6 = vunpack.c.h.bf16 %v2152_v51  ;;  %v2106_v51 = vld [vmem:[%s2922_s0 + $0x168] sm:$0xff]  }
 0x119   :  { %v912_v19 = vpop.permute.xlu1 %911  ;;  %v907_v26 = vpop.permute.xlu0 %906 }
 0x11a   :  { %v1297_v24 = vadd.f32 %v1296_v15, %v1098_v13  ;;  %v1402_v25 = vadd.f32 %v1401_v16, %v1198_v14  ;;  %v1100_v29 = vmul.f32 %v1816_v11, %v907_v26  ;;  %v1200_v30 = vmul.f32 %v2016_v12, %v907_v26 }
 0x11b   :  { %v1101_v38 = vmul.f32 %v1817_v20, %v912_v19  ;;  %v1201_v39 = vmul.f32 %v2017_v21, %v912_v19  ;;  %v1832_v12 = vunpack.c.l.bf16 %v2103_v2  ;;  %v2032_v13 = vunpack.c.l.bf16 %v2153_v3  ;;  %v2154_v19 = vld [vmem:[%s2922_s0 + $0x2e8] sm:$0xff]  }
 0x11c   :  { %v1298_v31 = vadd.f32 %v1297_v24, %v1099_v22  ;;  %v1403_v32 = vadd.f32 %v1402_v25, %v1199_v23  ;;  %v1833_v21 = vunpack.c.h.bf16 %v2103_v2  ;;  %v2033_v22 = vunpack.c.h.bf16 %v2153_v3  ;;  %v2107_v3 = vld [vmem:[%s2922_s0 + $0x170] sm:$0xff]  }
 0x11d   :  { %v922_v35 = vpop.permute.xlu1 %921  ;;  %v917_v42 = vpop.permute.xlu0 %916 }
 0x11e   :  { %v1299_v40 = vadd.f32 %v1298_v31, %v1100_v29  ;;  %v1404_v41 = vadd.f32 %v1403_v32, %v1200_v30  ;;  %v1102_v45 = vmul.f32 %v1820_v27, %v917_v42  ;;  %v1202_v47 = vmul.f32 %v2020_v28, %v917_v42 }
 0x11f   :  { %v1103_v55 = vmul.f32 %v1821_v36, %v922_v35  ;;  %v1203_v56 = vmul.f32 %v2021_v37, %v922_v35  ;;  %v1836_v28 = vunpack.c.l.bf16 %v2104_v18  ;;  %v2036_v29 = vunpack.c.l.bf16 %v2154_v19  ;;  %v2155_v35 = vld [vmem:[%s2922_s0 + $0x2f0] sm:$0xff]  }
 0x120   :  { %v1300_v48 = vadd.f32 %v1299_v40, %v1101_v38  ;;  %v1405_v49 = vadd.f32 %v1404_v41, %v1201_v39  ;;  %v1837_v37 = vunpack.c.h.bf16 %v2104_v18  ;;  %v2037_v38 = vunpack.c.h.bf16 %v2154_v19  ;;  %v2108_v19 = vld [vmem:[%s2922_s0 + $0x178] sm:$0xff]  }
 0x121   :  { %v932_v52 = vpop.permute.xlu1 %931  ;;  %v927_v59 = vpop.permute.xlu0 %926 }
 0x122   :  { %v1301_v57 = vadd.f32 %v1300_v48, %v1102_v45  ;;  %v1406_v58 = vadd.f32 %v1405_v49, %v1202_v47  ;;  %v1104_v62 = vmul.f32 %v1824_v43, %v927_v59  ;;  %v1204_v63 = vmul.f32 %v2024_v44, %v927_v59 }
 0x123   :  { %v1105_v7 = vmul.f32 %v1825_v53, %v932_v52  ;;  %v1205_v8 = vmul.f32 %v2025_v54, %v932_v52  ;;  %v1840_v44 = vunpack.c.l.bf16 %v2105_v34  ;;  %v2040_v45 = vunpack.c.l.bf16 %v2155_v35  ;;  %v2156_v52 = vld [vmem:[%s2922_s0 + $0x2f8] sm:$0xff]  }
 0x124   :  { %v1302_v0 = vadd.f32 %v1301_v57, %v1103_v55  ;;  %v1407_v1 = vadd.f32 %v1406_v58, %v1203_v56  ;;  %v1841_v54 = vunpack.c.h.bf16 %v2105_v34  ;;  %v2041_v55 = vunpack.c.h.bf16 %v2155_v35  ;;  %v2109_v35 = vld [vmem:[%s2922_s0 + $0x180] sm:$0xff]  }
 0x125   :  { %v942_v4 = vpop.permute.xlu1 %941  ;;  %v937_v11 = vpop.permute.xlu0 %936 }
 0x126   :  { %v1303_v9 = vadd.f32 %v1302_v0, %v1104_v62  ;;  %v1408_v10 = vadd.f32 %v1407_v1, %v1204_v63  ;;  %v1106_v14 = vmul.f32 %v1828_v60, %v937_v11  ;;  %v1206_v15 = vmul.f32 %v2028_v61, %v937_v11 }
 0x127   :  { %v1107_v23 = vmul.f32 %v1829_v5, %v942_v4  ;;  %v1207_v24 = vmul.f32 %v2029_v6, %v942_v4  ;;  %v1844_v61 = vunpack.c.l.bf16 %v2106_v51  ;;  %v2044_v62 = vunpack.c.l.bf16 %v2156_v52  ;;  %v2157_v4 = vld [vmem:[%s2922_s0 + $0x300] sm:$0xff]  }
 0x128   :  { %v1304_v16 = vadd.f32 %v1303_v9, %v1105_v7  ;;  %v1409_v17 = vadd.f32 %v1408_v10, %v1205_v8  ;;  %v1845_v6 = vunpack.c.h.bf16 %v2106_v51  ;;  %v2045_v7 = vunpack.c.h.bf16 %v2156_v52  ;;  %v2110_v52 = vld [vmem:[%s2922_s0 + $0x188] sm:$0xff]  }
 0x129   :  { %v952_v20 = vpop.permute.xlu1 %951  ;;  %v947_v27 = vpop.permute.xlu0 %946 }
 0x12a   :  { %v1305_v25 = vadd.f32 %v1304_v16, %v1106_v14  ;;  %v1410_v26 = vadd.f32 %v1409_v17, %v1206_v15  ;;  %v1108_v30 = vmul.f32 %v1832_v12, %v947_v27  ;;  %v1208_v31 = vmul.f32 %v2032_v13, %v947_v27 }
 0x12b   :  { %v1109_v39 = vmul.f32 %v1833_v21, %v952_v20  ;;  %v1209_v40 = vmul.f32 %v2033_v22, %v952_v20  ;;  %v1848_v13 = vunpack.c.l.bf16 %v2107_v3  ;;  %v2048_v14 = vunpack.c.l.bf16 %v2157_v4  ;;  %v2158_v20 = vld [vmem:[%s2922_s0 + $0x308] sm:$0xff]  }
 0x12c   :  { %v1306_v32 = vadd.f32 %v1305_v25, %v1107_v23  ;;  %v1411_v33 = vadd.f32 %v1410_v26, %v1207_v24  ;;  %v1849_v22 = vunpack.c.h.bf16 %v2107_v3  ;;  %v2049_v23 = vunpack.c.h.bf16 %v2157_v4 }
 0x12d   :  { %v962_v36 = vpop.permute.xlu1 %961  ;;  %v957_v43 = vpop.permute.xlu0 %956  ;;  %v1861_v4 = vunpack.c.h.bf16 %v2110_v52 }
 0x12e   :  { %v1307_v41 = vadd.f32 %v1306_v32, %v1108_v30  ;;  %v1412_v42 = vadd.f32 %v1411_v33, %v1208_v31  ;;  %v1110_v47 = vmul.f32 %v1836_v28, %v957_v43  ;;  %v1210_v48 = vmul.f32 %v2036_v29, %v957_v43 }
 0x12f   :  { %v1111_v56 = vmul.f32 %v1837_v37, %v962_v36  ;;  %v1211_v57 = vmul.f32 %v2037_v38, %v962_v36  ;;  %v1852_v29 = vunpack.c.l.bf16 %v2108_v19  ;;  %v2052_v30 = vunpack.c.l.bf16 %v2158_v20  ;;  %v2159_v36 = vld [vmem:[%s2922_s0 + $0x310] sm:$0xff]  }
 0x130   :  { %v1308_v49 = vadd.f32 %v1307_v41, %v1109_v39  ;;  %v1413_v50 = vadd.f32 %v1412_v42, %v1209_v40  ;;  %v1853_v38 = vunpack.c.h.bf16 %v2108_v19  ;;  %v2053_v39 = vunpack.c.h.bf16 %v2158_v20 }
 0x131   :  { %v972_v53 = vpop.permute.xlu1 %971  ;;  %v967_v60 = vpop.permute.xlu0 %966 }
 0x132   :  { %v1309_v58 = vadd.f32 %v1308_v49, %v1110_v47  ;;  %v1414_v59 = vadd.f32 %v1413_v50, %v1210_v48  ;;  %v1112_v63 = vmul.f32 %v1840_v44, %v967_v60  ;;  %v1212_v0 = vmul.f32 %v2040_v45, %v967_v60 }
 0x133   :  { %v1113_v8 = vmul.f32 %v1841_v54, %v972_v53  ;;  %v1213_v9 = vmul.f32 %v2041_v55, %v972_v53  ;;  %v1856_v45 = vunpack.c.l.bf16 %v2109_v35  ;;  %v2056_v47 = vunpack.c.l.bf16 %v2159_v36  ;;  %v2160_v53 = vld [vmem:[%s2922_s0 + $0x318] sm:$0xff]  }
 0x134   :  { %v1310_v1 = vadd.f32 %v1309_v58, %v1111_v56  ;;  %v1415_v2 = vadd.f32 %v1414_v59, %v1211_v57  ;;  %v1857_v55 = vunpack.c.h.bf16 %v2109_v35  ;;  %v2057_v56 = vunpack.c.h.bf16 %v2159_v36 }
 0x135   :  { %v982_v5 = vpop.permute.xlu1 %981  ;;  %v977_v12 = vpop.permute.xlu0 %976 }
 0x136   :  { %v1311_v10 = vadd.f32 %v1310_v1, %v1112_v63  ;;  %v1416_v11 = vadd.f32 %v1415_v2, %v1212_v0  ;;  %v1114_v15 = vmul.f32 %v1844_v61, %v977_v12  ;;  %v1214_v16 = vmul.f32 %v2044_v62, %v977_v12 }
 0x137   :  { %v1115_v24 = vmul.f32 %v1845_v6, %v982_v5  ;;  %v1215_v25 = vmul.f32 %v2045_v7, %v982_v5  ;;  %v1860_v62 = vunpack.c.l.bf16 %v2110_v52  ;;  %v2060_v63 = vunpack.c.l.bf16 %v2160_v53 }
 0x138   :  { %v1312_v17 = vadd.f32 %v1311_v10, %v1113_v8  ;;  %v1417_v18 = vadd.f32 %v1416_v11, %v1213_v9  ;;  %v2061_v5 = vunpack.c.h.bf16 %v2160_v53 }
 0x139   :  { %v992_v21 = vpop.permute.xlu1 %991  ;;  %v987_v28 = vpop.permute.xlu0 %986 }
 0x13a   :  { %v1313_v26 = vadd.f32 %v1312_v17, %v1114_v15  ;;  %v1418_v27 = vadd.f32 %v1417_v18, %v1214_v16  ;;  %v1116_v31 = vmul.f32 %v1848_v13, %v987_v28  ;;  %v1216_v32 = vmul.f32 %v2048_v14, %v987_v28 }
 0x13b   :  { %v1117_v40 = vmul.f32 %v1849_v22, %v992_v21  ;;  %v1217_v41 = vmul.f32 %v2049_v23, %v992_v21 }
 0x13c   :  { %v1314_v33 = vadd.f32 %v1313_v26, %v1115_v24  ;;  %v1419_v34 = vadd.f32 %v1418_v27, %v1215_v25 }
 0x13d   :  { %v1002_v37 = vpop.permute.xlu1 %1001  ;;  %v997_v44 = vpop.permute.xlu0 %996 }
 0x13e   :  { %v1315_v42 = vadd.f32 %v1314_v33, %v1116_v31  ;;  %v1420_v43 = vadd.f32 %v1419_v34, %v1216_v32  ;;  %v1118_v48 = vmul.f32 %v1852_v29, %v997_v44  ;;  %v1218_v49 = vmul.f32 %v2052_v30, %v997_v44 }
 0x13f   :  { %v1119_v57 = vmul.f32 %v1853_v38, %v1002_v37  ;;  %v1219_v58 = vmul.f32 %v2053_v39, %v1002_v37 }
 0x140   :  { %v1316_v50 = vadd.f32 %v1315_v42, %v1117_v40  ;;  %v1421_v51 = vadd.f32 %v1420_v43, %v1217_v41  ;;  %v2222_v40 = vld [vmem:[%s2924_s4 + $0x10] sm:$0xff]   ;;  %v2223_v41 = vld [vmem:[%s2924_s4 + $0x18] sm:$0xff]   ;;  %v1647_v42 = vld [vmem:[%s2925_s3] ss:$0 sm:$0xff] }
 0x141   :  { %v1012_v54 = vpop.permute.xlu1 %1011  ;;  %v1007_v61 = vpop.permute.xlu0 %1006  ;;  %2200 = vmatpush3.bf16.msra.mxu1 %v2222_v40 }
 0x142   :  { %v1317_v59 = vadd.f32 %v1316_v50, %v1118_v48  ;;  %v1422_v60 = vadd.f32 %v1421_v51, %v1218_v49  ;;  %v1120_v0 = vmul.f32 %v1856_v45, %v1007_v61  ;;  %v1220_v1 = vmul.f32 %v2056_v47, %v1007_v61  ;;  %2201 = vmatprep.subr.bf16.mxu1 %v2225_v46  ;;  %v1656_v46 = vld [vmem:[%s2926_s5] ss:$0 sm:$0xff] }
 0x143   :  { %v1121_v6 = vmul.f32 %v1857_v55, %v1012_v54  ;;  %v1221_v7 = vmul.f32 %v2057_v56, %v1012_v54 }
 0x144   :  { %v1318_v2 = vadd.f32 %v1317_v59, %v1119_v57  ;;  %v1423_v3 = vadd.f32 %v1422_v60, %v1219_v58 }
 0x145   :  { %v1017_v10 = vpop.permute.xlu0 %1016  ;;  %v1022_v11 = vpop.permute.xlu1 %1021  ;;  %2202 = vmatpush3.bf16.msra.mxu1 %v2223_v41 }
 0x146   :  { %v1319_v8 = vadd.f32 %v1318_v2, %v1120_v0  ;;  %v1424_v9 = vadd.f32 %v1423_v3, %v1220_v1  ;;  %v1122_v12 = vmul.f32 %v1860_v62, %v1017_v10  ;;  %v1222_v13 = vmul.f32 %v2060_v63, %v1017_v10 }
 0x147   :  { %v1123_v16 = vmul.f32 %v1861_v4, %v1022_v11  ;;  %v1223_v17 = vmul.f32 %v2061_v5, %v1022_v11 }
 0x148   :  { %v1320_v14 = vadd.f32 %v1319_v8, %v1121_v6  ;;  %v1425_v15 = vadd.f32 %v1424_v9, %v1221_v7 }
 0x14a   :  { %v1321_v18 = vadd.f32 %v1320_v14, %v1122_v12  ;;  %v1426_v19 = vadd.f32 %v1425_v15, %v1222_v13 }
 0x14c   :  { %v1322_v20 = vadd.f32 %v1321_v18, %v1123_v16  ;;  %v1427_v21 = vadd.f32 %v1426_v19, %v1223_v17 }
 0x14e   :  { %v1323_v22 = vrot.slane %v1322_v20, 4  ;;  %v1428_v23 = vrot.slane %v1427_v21, 4 }
 0x150   :  { %v1324_v24 = vadd.f32 %v1323_v22, %v1322_v20  ;;  %v1429_v25 = vadd.f32 %v1428_v23, %v1427_v21 }
 0x152   :  { %v1325_v26 = vrot.slane %v1324_v24, 2  ;;  %v1430_v27 = vrot.slane %v1429_v25, 2 }
 0x154   :  { %v1326_v28 = vadd.f32 %v1325_v26, %v1324_v24  ;;  %v1431_v29 = vadd.f32 %v1430_v27, %v1429_v25 }
 0x156   :  { %v1327_v30 = vrot.slane %v1326_v28, 1  ;;  %v1432_v31 = vrot.slane %v1431_v29, 1 }
 0x158   :  { %v1328_v32 = vadd.f32 %v1327_v30, %v1326_v28  ;;  %v1433_v33 = vadd.f32 %v1432_v31, %v1431_v29 }
 0x15a   :  { %v1434_v34 = vpack.c.bf16 %v1328_v32, %v1328_v32  ;;  %v1435_v35 = vpack.c.bf16 %v1433_v33, %v1433_v33 }
 0x15c   :  { %v1461_v36 = vunpack.c.l.b16 %v1434_v34  ;;  %v1462_v37 = vunpack.c.l.b16 %v1435_v35 }
 0x15e   :  { %v1464_v38 = vsel %vm1463_vm1, %v1462_v37, %v1461_v36 }
 0x15f   :  { %v1465_v39 = vpack.c.b16 %v1464_v38, %v1464_v38 }
 0x161   :  { %2192 = vmatmul.mubr.bf16.vlgmr.msra.gmra.mrb[0].mxu0 %v1465_v39 }
 0x234   :  { %v1549_v43 = vpop.f32.mrb[0].mxu0 }
 0x235   :  { %v1550_v44 = vadd.f32 %v1647_v42, %v1549_v43  ;;  %v2193_v45 = vpop.f32.mrb[1].mxu0 }
 0x236   :  { %v1552_v47 = vpop.f32.mrb[2].mxu0 }
 0x237   :  { %vm1555_vm2 = vcmp.gt.f32.partialorder %v1550_v44, 0.0  ;;  %v1556_v48 = vmul.f32 0.2, %v1550_v44  ;;  %v2194_v49 = vpop.f32.mrb[3].mxu0 }
 0x239   :  { %v1557_v50 = vsel %vm1555_vm2, %v1550_v44, %v1556_v48 }
 0x23a   :  { %v1558_v51 = vpack.c.bf16 %v1557_v50, %v1557_v50 }
 0x23c   :  { %2204 = vmatmul.mubr.msk.bf16.vlgmr.msra.gmra.mrb[0].mxu1 %vm1598_vm3, %v1558_v51 }
 0x30f   :  { %v1636_v52 = vpop.f32.mrb[0].mxu1 }
 0x310   :  { %v1637_v53 = vadd.f32 %v1656_v46, %v1636_v52  ;;  %v2205_v54 = vpop.f32.mrb[1].mxu1 }
 0x311   :  { %v1639_v55 = vpop.f32.mrb[2].mxu1 }
 0x312   :  { %1642 = vst [vmem:[%s2927_s6] sm:$0x3] %v1637_v53  ;;  %v2206_v56 = vpop.f32.mrb[3].mxu1 }

</bundles_post_ra>
